<compile_context>
chip_gen: v6e
topology: v6e:2x2x1
jax: 0.10.0
libtpu: 0.0.40
codegen_flags: <defaults>
</compile_context>

<pallas_src>
import functools

import jax
import jax.numpy as jnp
from jax.experimental import pallas as pl
from jax.experimental.pallas import tpu as pltpu


def _rup(n, m):
    return ((n + m - 1) // m) * m


def _pad2(a, rows, cols):
    return jnp.pad(a, ((0, rows - a.shape[0]), (0, cols - a.shape[1])))


# ---------------------------------------------------------------------------
# Fused kernel: full MLP_Res forward on padded, VMEM-resident blocks.
# ---------------------------------------------------------------------------
def _mlp_res_kernel(
    x_ref,
    w11_ref, b11_ref, w12_ref, b12_ref, w1r_ref, b1r_ref, g1_ref, be1_ref,
    w21_ref, b21_ref, w22_ref, b22_ref, w2r_ref, b2r_ref, g2_ref, be2_ref,
    w31_ref, b31_ref, w32_ref, b32_ref, w3r_ref, b3r_ref, g3_ref, be3_ref,
    o_ref,
    *, n1, n2, n3, eps, neg_slope,
):
    f32 = jnp.float32

    def linear(h, w_ref, b_ref):
        # Weights may be stored narrower (e.g. bf16); always accumulate in f32.
        return jnp.dot(h, w_ref[...].astype(f32),
                       preferred_element_type=f32) + b_ref[...].astype(f32)

    def lrelu(h):
        return jnp.where(h >= 0, h, f32(neg_slope) * h)

    def lane_mask(npad, n):
        return jax.lax.broadcasted_iota(jnp.int32, (1, npad), 1) < n

    def layer_norm(s, n, g_ref, b_ref):
        # Padded lanes of `s` are exactly zero (zero-padded weights/biases),
        # so sum(s)/n is the true mean; mask the centered values so padded
        # lanes don't pollute the variance, and padded outputs stay zero.
        npad = s.shape[-1]
        mask = lane_mask(npad, n).astype(f32)
        inv_n = f32(1.0 / n)
        mean = jnp.sum(s, axis=-1, keepdims=True) * inv_n
        d = (s - mean) * mask
        var = jnp.sum(d * d, axis=-1, keepdims=True) * inv_n
        return (d * jax.lax.rsqrt(var + f32(eps)) * g_ref[...].astype(f32)
                + b_ref[...].astype(f32))

    x = x_ref[...].astype(f32)

    # residual block 1
    s = (linear(lrelu(linear(x, w11_ref, b11_ref)), w12_ref, b12_ref)
         + linear(x, w1r_ref, b1r_ref))
    x = layer_norm(s, n1, g1_ref, be1_ref)

    # residual block 2
    s = (linear(lrelu(linear(x, w21_ref, b21_ref)), w22_ref, b22_ref)
         + linear(x, w2r_ref, b2r_ref))
    x = layer_norm(s, n2, g2_ref, be2_ref)

    # residual block 3
    s = (linear(lrelu(linear(x, w31_ref, b31_ref)), w32_ref, b32_ref)
         + linear(x, w3r_ref, b3r_ref))
    x = layer_norm(s, n3, g3_ref, be3_ref)

    # softmax over the n3 valid lanes (padded lanes -> 0, sliced off on host)
    mask = lane_mask(x.shape[-1], n3)
    logits = jnp.where(mask, x, f32(-1e30))
    m = jnp.max(logits, axis=-1, keepdims=True)
    e = jnp.where(mask, jnp.exp(logits - m), f32(0.0))
    o_ref[...] = (e / jnp.sum(e, axis=-1, keepdims=True)).astype(o_ref.dtype)


# ---------------------------------------------------------------------------
# Parameter construction (PyTorch-style init) and one-time padding/casting.
# ---------------------------------------------------------------------------
def init_params(key, input_size):
    D = input_size
    lin_dims = [
        (D, D + 300), (D + 300, D + 500), (D, D + 500),        # fc1_l1, fc1_l2, fc1_rw
        (D + 500, D), (D, D // 2), (D + 500, D // 2),          # fc2_l1, fc2_l2, fc2_rw
        (D // 2, D // 4), (D // 4, 2), (D // 2, 2),            # fc3_l1, fc3_l2, fc3_rw
    ]
    ln_dims = [D + 500, D // 2, 2]
    linears = []
    for fan_in, fan_out in lin_dims:
        key, kw, kb = jax.random.split(key, 3)
        bound = 1.0 / (fan_in ** 0.5)
        w = jax.random.uniform(kw, (fan_in, fan_out), jnp.float32, -bound, bound)
        b = jax.random.uniform(kb, (fan_out,), jnp.float32, -bound, bound)
        linears.append((w, b))
    lns = [(jnp.ones((n,), jnp.float32), jnp.zeros((n,), jnp.float32))
           for n in ln_dims]
    return linears, lns


def prepare_params(linears, lns, weight_dtype=jnp.float32):
    """Pad (and optionally cast) parameters ONCE; returns the flat kernel args."""
    flat = []
    for blk in range(3):
        for (w, b) in linears[3 * blk: 3 * blk + 3]:
            kp = _rup(w.shape[0], 128)
            npad = _rup(w.shape[1], 128)
            flat.append(_pad2(w.astype(weight_dtype), kp, npad))
            flat.append(_pad2(b.astype(jnp.float32).reshape(1, -1), 1, npad))
        g, be = lns[blk]
        npad = _rup(g.shape[0], 128)
        flat.append(_pad2(g.astype(jnp.float32).reshape(1, -1), 1, npad))
        flat.append(_pad2(be.astype(jnp.float32).reshape(1, -1), 1, npad))
    return tuple(flat)


@functools.partial(jax.jit, static_argnames=("input_size",))
def mlp_res_forward(x, padded_params, *, input_size):
    B, D = x.shape
    B_pad = _rup(max(B, 8), 8)
    D_pad = _rup(D, 128)
    x_pad = jnp.pad(x.astype(jnp.float32), ((0, B_pad - B), (0, D_pad - D)))

    n1 = input_size + 500
    n2 = input_size // 2
    n3 = 2
    out_pad = _rup(n3, 128)

    kernel = functools.partial(
        _mlp_res_kernel, n1=n1, n2=n2, n3=n3, eps=1e-5, neg_slope=0.01)

    out = pl.pallas_call(
        kernel,
        out_shape=jax.ShapeDtypeStruct((B_pad, out_pad), jnp.float32),
        compiler_params=pltpu.CompilerParams(
            vmem_limit_bytes=32 * 1024 * 1024),
    )(x_pad, *padded_params)
    return out[:B, :n3]


# ---------------------------------------------------------------------------
# Pure-JAX reference for correctness.
# ---------------------------------------------------------------------------
def ref_forward(x, linears, lns):
    def ln(s, g, b, eps=1e-5):
        mean = jnp.mean(s, axis=-1, keepdims=True)
        var = jnp.mean((s - mean) ** 2, axis=-1, keepdims=True)
        return (s - mean) / jnp.sqrt(var + eps) * g + b

    lrelu = lambda h: jnp.where(h >= 0, h, 0.01 * h)
    h = x.astype(jnp.float32)
    for blk in range(3):
        (w1, b1), (w2, b2), (wr, br) = linears[3 * blk: 3 * blk + 3]
        g, be = lns[blk]
        s = (lrelu(h @ w1 + b1) @ w2 + b2) + (h @ wr + br)
        h = ln(s, g, be)
    return jax.nn.softmax(h, axis=1)


if __name__ == "__main__":
    input_size = 64          # small, divisible by 4 (module uses /2 and /4)
    batch = 2

    key = jax.random.PRNGKey(0)
    key, kx = jax.random.split(key)
    linears, lns = init_params(key, input_size)
    padded = prepare_params(linears, lns)      # pad/cast once, outside forward

    x = jax.random.normal(kx, (batch, input_size), jnp.float32)

    out = mlp_res_forward(x, padded, input_size=input_size)
    out = jax.block_until_ready(out)

    ref = ref_forward(x, linears, lns)
    assert out.shape == (batch, 2), out.shape
    assert bool(jnp.all(jnp.isfinite(out)))
    assert jnp.allclose(out, ref, rtol=1e-3, atol=1e-3), (out, ref)
    print("KERNEL_OK")
</pallas_src>

<mosaic_0001>
module attributes {stable_mosaic.version = 11 : i64} {
  func.func @_mlp_res_kernel(%arg0: memref<8x128xf32, #tpu.memory_space<vmem>>, %arg1: memref<128x384xf32, #tpu.memory_space<vmem>>, %arg2: memref<1x384xf32, #tpu.memory_space<vmem>>, %arg3: memref<384x640xf32, #tpu.memory_space<vmem>>, %arg4: memref<1x640xf32, #tpu.memory_space<vmem>>, %arg5: memref<128x640xf32, #tpu.memory_space<vmem>>, %arg6: memref<1x640xf32, #tpu.memory_space<vmem>>, %arg7: memref<1x640xf32, #tpu.memory_space<vmem>>, %arg8: memref<1x640xf32, #tpu.memory_space<vmem>>, %arg9: memref<640x128xf32, #tpu.memory_space<vmem>>, %arg10: memref<1x128xf32, #tpu.memory_space<vmem>>, %arg11: memref<128x128xf32, #tpu.memory_space<vmem>>, %arg12: memref<1x128xf32, #tpu.memory_space<vmem>>, %arg13: memref<640x128xf32, #tpu.memory_space<vmem>>, %arg14: memref<1x128xf32, #tpu.memory_space<vmem>>, %arg15: memref<1x128xf32, #tpu.memory_space<vmem>>, %arg16: memref<1x128xf32, #tpu.memory_space<vmem>>, %arg17: memref<128x128xf32, #tpu.memory_space<vmem>>, %arg18: memref<1x128xf32, #tpu.memory_space<vmem>>, %arg19: memref<128x128xf32, #tpu.memory_space<vmem>>, %arg20: memref<1x128xf32, #tpu.memory_space<vmem>>, %arg21: memref<128x128xf32, #tpu.memory_space<vmem>>, %arg22: memref<1x128xf32, #tpu.memory_space<vmem>>, %arg23: memref<1x128xf32, #tpu.memory_space<vmem>>, %arg24: memref<1x128xf32, #tpu.memory_space<vmem>>, %arg25: memref<8x128xf32, #tpu.memory_space<vmem>>) attributes {dimension_semantics = [], scalar_prefetch = 0 : i64, scratch_operands = 0 : i64, tpu.core_type = #tpu.core_type<tc>} {
    %c0 = arith.constant 0 : index
    %c0_0 = arith.constant 0 : index
    %0 = vector.load %arg0[%c0, %c0_0] : memref<8x128xf32, #tpu.memory_space<vmem>>, vector<8x128xf32>
    %c0_1 = arith.constant 0 : index
    %c0_2 = arith.constant 0 : index
    %1 = vector.load %arg1[%c0_1, %c0_2] : memref<128x384xf32, #tpu.memory_space<vmem>>, vector<128x384xf32>
    %cst = arith.constant dense<0.000000e+00> : vector<8x384xf32>
    %2 = tpu.matmul %0, %1, %cst {dimension_numbers = #tpu.dot_dimension_numbers<[1], [0], [0], [1], [0, 0, 1, 1], [], []>} : vector<8x128xf32>, vector<128x384xf32>, vector<8x384xf32> -> vector<8x384xf32>
    %c0_3 = arith.constant 0 : index
    %c0_4 = arith.constant 0 : index
    %3 = vector.load %arg2[%c0_3, %c0_4] : memref<1x384xf32, #tpu.memory_space<vmem>>, vector<1x384xf32>
    %4 = vector.broadcast %3 : vector<1x384xf32> to vector<8x384xf32>
    %5 = arith.addf %2, %4 : vector<8x384xf32>
    %cst_5 = arith.constant 0.000000e+00 : f32
    %6 = vector.broadcast %cst_5 : f32 to vector<8x384xf32>
    %7 = arith.cmpf oge, %5, %6 : vector<8x384xf32>
    %cst_6 = arith.constant 0.00999999977 : f32
    %8 = vector.broadcast %cst_6 : f32 to vector<8x384xf32>
    %9 = arith.mulf %8, %5 : vector<8x384xf32>
    %10 = arith.select %7, %5, %9 : vector<8x384xi1>, vector<8x384xf32>
    %c0_7 = arith.constant 0 : index
    %c0_8 = arith.constant 0 : index
    %11 = vector.load %arg3[%c0_7, %c0_8] : memref<384x640xf32, #tpu.memory_space<vmem>>, vector<384x640xf32>
    %cst_9 = arith.constant dense<0.000000e+00> : vector<8x640xf32>
    %12 = tpu.matmul %10, %11, %cst_9 {dimension_numbers = #tpu.dot_dimension_numbers<[1], [0], [0], [1], [0, 0, 1, 1], [], []>} : vector<8x384xf32>, vector<384x640xf32>, vector<8x640xf32> -> vector<8x640xf32>
    %c0_10 = arith.constant 0 : index
    %c0_11 = arith.constant 0 : index
    %13 = vector.load %arg4[%c0_10, %c0_11] : memref<1x640xf32, #tpu.memory_space<vmem>>, vector<1x640xf32>
    %14 = vector.broadcast %13 : vector<1x640xf32> to vector<8x640xf32>
    %15 = arith.addf %12, %14 : vector<8x640xf32>
    %c0_12 = arith.constant 0 : index
    %c0_13 = arith.constant 0 : index
    %16 = vector.load %arg5[%c0_12, %c0_13] : memref<128x640xf32, #tpu.memory_space<vmem>>, vector<128x640xf32>
    %cst_14 = arith.constant dense<0.000000e+00> : vector<8x640xf32>
    %17 = tpu.matmul %0, %16, %cst_14 {dimension_numbers = #tpu.dot_dimension_numbers<[1], [0], [0], [1], [0, 0, 1, 1], [], []>} : vector<8x128xf32>, vector<128x640xf32>, vector<8x640xf32> -> vector<8x640xf32>
    %c0_15 = arith.constant 0 : index
    %c0_16 = arith.constant 0 : index
    %18 = vector.load %arg6[%c0_15, %c0_16] : memref<1x640xf32, #tpu.memory_space<vmem>>, vector<1x640xf32>
    %19 = vector.broadcast %18 : vector<1x640xf32> to vector<8x640xf32>
    %20 = arith.addf %17, %19 : vector<8x640xf32>
    %21 = arith.addf %15, %20 : vector<8x640xf32>
    %22 = tpu.iota {dimensions = array<i32: 1>} : vector<1x640xi32>
    %c564_i32 = arith.constant 564 : i32
    %23 = vector.broadcast %c564_i32 : i32 to vector<1x640xi32>
    %24 = arith.cmpi slt, %22, %23 : vector<1x640xi32>
    %25 = arith.extui %24 : vector<1x640xi1> to vector<1x640xi32>
    %26 = arith.sitofp %25 : vector<1x640xi32> to vector<1x640xf32>
    %cst_17 = arith.constant dense<0.000000e+00> : vector<8xf32>
    %27 = vector.multi_reduction <add>, %21, %cst_17 [1] : vector<8x640xf32> to vector<8xf32>
    %28 = vector.shape_cast %27 : vector<8xf32> to vector<8x1xf32>
    %cst_18 = arith.constant 0.00177304959 : f32
    %29 = vector.broadcast %cst_18 : f32 to vector<8x1xf32>
    %30 = arith.mulf %28, %29 : vector<8x1xf32>
    %31 = vector.broadcast %30 : vector<8x1xf32> to vector<8x640xf32>
    %32 = arith.subf %21, %31 : vector<8x640xf32>
    %33 = vector.broadcast %26 : vector<1x640xf32> to vector<8x640xf32>
    %34 = arith.mulf %32, %33 : vector<8x640xf32>
    %35 = arith.mulf %34, %34 : vector<8x640xf32>
    %cst_19 = arith.constant dense<0.000000e+00> : vector<8xf32>
    %36 = vector.multi_reduction <add>, %35, %cst_19 [1] : vector<8x640xf32> to vector<8xf32>
    %37 = vector.shape_cast %36 : vector<8xf32> to vector<8x1xf32>
    %cst_20 = arith.constant 0.00177304959 : f32
    %38 = vector.broadcast %cst_20 : f32 to vector<8x1xf32>
    %39 = arith.mulf %37, %38 : vector<8x1xf32>
    %cst_21 = arith.constant 9.99999974E-6 : f32
    %40 = vector.broadcast %cst_21 : f32 to vector<8x1xf32>
    %41 = arith.addf %39, %40 : vector<8x1xf32>
    %42 = math.rsqrt %41 : vector<8x1xf32>
    %43 = vector.broadcast %42 : vector<8x1xf32> to vector<8x640xf32>
    %44 = arith.mulf %34, %43 : vector<8x640xf32>
    %c0_22 = arith.constant 0 : index
    %c0_23 = arith.constant 0 : index
    %45 = vector.load %arg7[%c0_22, %c0_23] : memref<1x640xf32, #tpu.memory_space<vmem>>, vector<1x640xf32>
    %46 = vector.broadcast %45 : vector<1x640xf32> to vector<8x640xf32>
    %47 = arith.mulf %44, %46 : vector<8x640xf32>
    %c0_24 = arith.constant 0 : index
    %c0_25 = arith.constant 0 : index
    %48 = vector.load %arg8[%c0_24, %c0_25] : memref<1x640xf32, #tpu.memory_space<vmem>>, vector<1x640xf32>
    %49 = vector.broadcast %48 : vector<1x640xf32> to vector<8x640xf32>
    %50 = arith.addf %47, %49 : vector<8x640xf32>
    %c0_26 = arith.constant 0 : index
    %c0_27 = arith.constant 0 : index
    %51 = vector.load %arg9[%c0_26, %c0_27] : memref<640x128xf32, #tpu.memory_space<vmem>>, vector<640x128xf32>
    %cst_28 = arith.constant dense<0.000000e+00> : vector<8x128xf32>
    %52 = tpu.matmul %50, %51, %cst_28 {dimension_numbers = #tpu.dot_dimension_numbers<[1], [0], [0], [1], [0, 0, 1, 1], [], []>} : vector<8x640xf32>, vector<640x128xf32>, vector<8x128xf32> -> vector<8x128xf32>
    %c0_29 = arith.constant 0 : index
    %c0_30 = arith.constant 0 : index
    %53 = vector.load %arg10[%c0_29, %c0_30] : memref<1x128xf32, #tpu.memory_space<vmem>>, vector<1x128xf32>
    %54 = vector.broadcast %53 : vector<1x128xf32> to vector<8x128xf32>
    %55 = arith.addf %52, %54 : vector<8x128xf32>
    %cst_31 = arith.constant 0.000000e+00 : f32
    %56 = vector.broadcast %cst_31 : f32 to vector<8x128xf32>
    %57 = arith.cmpf oge, %55, %56 : vector<8x128xf32>
    %cst_32 = arith.constant 0.00999999977 : f32
    %58 = vector.broadcast %cst_32 : f32 to vector<8x128xf32>
    %59 = arith.mulf %58, %55 : vector<8x128xf32>
    %60 = arith.select %57, %55, %59 : vector<8x128xi1>, vector<8x128xf32>
    %c0_33 = arith.constant 0 : index
    %c0_34 = arith.constant 0 : index
    %61 = vector.load %arg11[%c0_33, %c0_34] : memref<128x128xf32, #tpu.memory_space<vmem>>, vector<128x128xf32>
    %cst_35 = arith.constant dense<0.000000e+00> : vector<8x128xf32>
    %62 = tpu.matmul %60, %61, %cst_35 {dimension_numbers = #tpu.dot_dimension_numbers<[1], [0], [0], [1], [0, 0, 1, 1], [], []>} : vector<8x128xf32>, vector<128x128xf32>, vector<8x128xf32> -> vector<8x128xf32>
    %c0_36 = arith.constant 0 : index
    %c0_37 = arith.constant 0 : index
    %63 = vector.load %arg12[%c0_36, %c0_37] : memref<1x128xf32, #tpu.memory_space<vmem>>, vector<1x128xf32>
    %64 = vector.broadcast %63 : vector<1x128xf32> to vector<8x128xf32>
    %65 = arith.addf %62, %64 : vector<8x128xf32>
    %c0_38 = arith.constant 0 : index
    %c0_39 = arith.constant 0 : index
    %66 = vector.load %arg13[%c0_38, %c0_39] : memref<640x128xf32, #tpu.memory_space<vmem>>, vector<640x128xf32>
    %cst_40 = arith.constant dense<0.000000e+00> : vector<8x128xf32>
    %67 = tpu.matmul %50, %66, %cst_40 {dimension_numbers = #tpu.dot_dimension_numbers<[1], [0], [0], [1], [0, 0, 1, 1], [], []>} : vector<8x640xf32>, vector<640x128xf32>, vector<8x128xf32> -> vector<8x128xf32>
    %c0_41 = arith.constant 0 : index
    %c0_42 = arith.constant 0 : index
    %68 = vector.load %arg14[%c0_41, %c0_42] : memref<1x128xf32, #tpu.memory_space<vmem>>, vector<1x128xf32>
    %69 = vector.broadcast %68 : vector<1x128xf32> to vector<8x128xf32>
    %70 = arith.addf %67, %69 : vector<8x128xf32>
    %71 = arith.addf %65, %70 : vector<8x128xf32>
    %72 = tpu.iota {dimensions = array<i32: 1>} : vector<1x128xi32>
    %c32_i32 = arith.constant 32 : i32
    %73 = vector.broadcast %c32_i32 : i32 to vector<1x128xi32>
    %74 = arith.cmpi slt, %72, %73 : vector<1x128xi32>
    %75 = arith.extui %74 : vector<1x128xi1> to vector<1x128xi32>
    %76 = arith.sitofp %75 : vector<1x128xi32> to vector<1x128xf32>
    %cst_43 = arith.constant dense<0.000000e+00> : vector<8xf32>
    %77 = vector.multi_reduction <add>, %71, %cst_43 [1] : vector<8x128xf32> to vector<8xf32>
    %78 = vector.shape_cast %77 : vector<8xf32> to vector<8x1xf32>
    %cst_44 = arith.constant 3.125000e-02 : f32
    %79 = vector.broadcast %cst_44 : f32 to vector<8x1xf32>
    %80 = arith.mulf %78, %79 : vector<8x1xf32>
    %81 = vector.broadcast %80 : vector<8x1xf32> to vector<8x128xf32>
    %82 = arith.subf %71, %81 : vector<8x128xf32>
    %83 = vector.broadcast %76 : vector<1x128xf32> to vector<8x128xf32>
    %84 = arith.mulf %82, %83 : vector<8x128xf32>
    %85 = arith.mulf %84, %84 : vector<8x128xf32>
    %cst_45 = arith.constant dense<0.000000e+00> : vector<8xf32>
    %86 = vector.multi_reduction <add>, %85, %cst_45 [1] : vector<8x128xf32> to vector<8xf32>
    %87 = vector.shape_cast %86 : vector<8xf32> to vector<8x1xf32>
    %cst_46 = arith.constant 3.125000e-02 : f32
    %88 = vector.broadcast %cst_46 : f32 to vector<8x1xf32>
    %89 = arith.mulf %87, %88 : vector<8x1xf32>
    %cst_47 = arith.constant 9.99999974E-6 : f32
    %90 = vector.broadcast %cst_47 : f32 to vector<8x1xf32>
    %91 = arith.addf %89, %90 : vector<8x1xf32>
    %92 = math.rsqrt %91 : vector<8x1xf32>
    %93 = vector.broadcast %92 : vector<8x1xf32> to vector<8x128xf32>
    %94 = arith.mulf %84, %93 : vector<8x128xf32>
    %c0_48 = arith.constant 0 : index
    %c0_49 = arith.constant 0 : index
    %95 = vector.load %arg15[%c0_48, %c0_49] : memref<1x128xf32, #tpu.memory_space<vmem>>, vector<1x128xf32>
    %96 = vector.broadcast %95 : vector<1x128xf32> to vector<8x128xf32>
    %97 = arith.mulf %94, %96 : vector<8x128xf32>
    %c0_50 = arith.constant 0 : index
    %c0_51 = arith.constant 0 : index
    %98 = vector.load %arg16[%c0_50, %c0_51] : memref<1x128xf32, #tpu.memory_space<vmem>>, vector<1x128xf32>
    %99 = vector.broadcast %98 : vector<1x128xf32> to vector<8x128xf32>
    %100 = arith.addf %97, %99 : vector<8x128xf32>
    %c0_52 = arith.constant 0 : index
    %c0_53 = arith.constant 0 : index
    %101 = vector.load %arg17[%c0_52, %c0_53] : memref<128x128xf32, #tpu.memory_space<vmem>>, vector<128x128xf32>
    %cst_54 = arith.constant dense<0.000000e+00> : vector<8x128xf32>
    %102 = tpu.matmul %100, %101, %cst_54 {dimension_numbers = #tpu.dot_dimension_numbers<[1], [0], [0], [1], [0, 0, 1, 1], [], []>} : vector<8x128xf32>, vector<128x128xf32>, vector<8x128xf32> -> vector<8x128xf32>
    %c0_55 = arith.constant 0 : index
    %c0_56 = arith.constant 0 : index
    %103 = vector.load %arg18[%c0_55, %c0_56] : memref<1x128xf32, #tpu.memory_space<vmem>>, vector<1x128xf32>
    %104 = vector.broadcast %103 : vector<1x128xf32> to vector<8x128xf32>
    %105 = arith.addf %102, %104 : vector<8x128xf32>
    %cst_57 = arith.constant 0.000000e+00 : f32
    %106 = vector.broadcast %cst_57 : f32 to vector<8x128xf32>
    %107 = arith.cmpf oge, %105, %106 : vector<8x128xf32>
    %cst_58 = arith.constant 0.00999999977 : f32
    %108 = vector.broadcast %cst_58 : f32 to vector<8x128xf32>
    %109 = arith.mulf %108, %105 : vector<8x128xf32>
    %110 = arith.select %107, %105, %109 : vector<8x128xi1>, vector<8x128xf32>
    %c0_59 = arith.constant 0 : index
    %c0_60 = arith.constant 0 : index
    %111 = vector.load %arg19[%c0_59, %c0_60] : memref<128x128xf32, #tpu.memory_space<vmem>>, vector<128x128xf32>
    %cst_61 = arith.constant dense<0.000000e+00> : vector<8x128xf32>
    %112 = tpu.matmul %110, %111, %cst_61 {dimension_numbers = #tpu.dot_dimension_numbers<[1], [0], [0], [1], [0, 0, 1, 1], [], []>} : vector<8x128xf32>, vector<128x128xf32>, vector<8x128xf32> -> vector<8x128xf32>
    %c0_62 = arith.constant 0 : index
    %c0_63 = arith.constant 0 : index
    %113 = vector.load %arg20[%c0_62, %c0_63] : memref<1x128xf32, #tpu.memory_space<vmem>>, vector<1x128xf32>
    %114 = vector.broadcast %113 : vector<1x128xf32> to vector<8x128xf32>
    %115 = arith.addf %112, %114 : vector<8x128xf32>
    %c0_64 = arith.constant 0 : index
    %c0_65 = arith.constant 0 : index
    %116 = vector.load %arg21[%c0_64, %c0_65] : memref<128x128xf32, #tpu.memory_space<vmem>>, vector<128x128xf32>
    %cst_66 = arith.constant dense<0.000000e+00> : vector<8x128xf32>
    %117 = tpu.matmul %100, %116, %cst_66 {dimension_numbers = #tpu.dot_dimension_numbers<[1], [0], [0], [1], [0, 0, 1, 1], [], []>} : vector<8x128xf32>, vector<128x128xf32>, vector<8x128xf32> -> vector<8x128xf32>
    %c0_67 = arith.constant 0 : index
    %c0_68 = arith.constant 0 : index
    %118 = vector.load %arg22[%c0_67, %c0_68] : memref<1x128xf32, #tpu.memory_space<vmem>>, vector<1x128xf32>
    %119 = vector.broadcast %118 : vector<1x128xf32> to vector<8x128xf32>
    %120 = arith.addf %117, %119 : vector<8x128xf32>
    %121 = arith.addf %115, %120 : vector<8x128xf32>
    %122 = tpu.iota {dimensions = array<i32: 1>} : vector<1x128xi32>
    %c2_i32 = arith.constant 2 : i32
    %123 = vector.broadcast %c2_i32 : i32 to vector<1x128xi32>
    %124 = arith.cmpi slt, %122, %123 : vector<1x128xi32>
    %125 = arith.extui %124 : vector<1x128xi1> to vector<1x128xi32>
    %126 = arith.sitofp %125 : vector<1x128xi32> to vector<1x128xf32>
    %cst_69 = arith.constant dense<0.000000e+00> : vector<8xf32>
    %127 = vector.multi_reduction <add>, %121, %cst_69 [1] : vector<8x128xf32> to vector<8xf32>
    %128 = vector.shape_cast %127 : vector<8xf32> to vector<8x1xf32>
    %cst_70 = arith.constant 5.000000e-01 : f32
    %129 = vector.broadcast %cst_70 : f32 to vector<8x1xf32>
    %130 = arith.mulf %128, %129 : vector<8x1xf32>
    %131 = vector.broadcast %130 : vector<8x1xf32> to vector<8x128xf32>
    %132 = arith.subf %121, %131 : vector<8x128xf32>
    %133 = vector.broadcast %126 : vector<1x128xf32> to vector<8x128xf32>
    %134 = arith.mulf %132, %133 : vector<8x128xf32>
    %135 = arith.mulf %134, %134 : vector<8x128xf32>
    %cst_71 = arith.constant dense<0.000000e+00> : vector<8xf32>
    %136 = vector.multi_reduction <add>, %135, %cst_71 [1] : vector<8x128xf32> to vector<8xf32>
    %137 = vector.shape_cast %136 : vector<8xf32> to vector<8x1xf32>
    %cst_72 = arith.constant 5.000000e-01 : f32
    %138 = vector.broadcast %cst_72 : f32 to vector<8x1xf32>
    %139 = arith.mulf %137, %138 : vector<8x1xf32>
    %cst_73 = arith.constant 9.99999974E-6 : f32
    %140 = vector.broadcast %cst_73 : f32 to vector<8x1xf32>
    %141 = arith.addf %139, %140 : vector<8x1xf32>
    %142 = math.rsqrt %141 : vector<8x1xf32>
    %143 = vector.broadcast %142 : vector<8x1xf32> to vector<8x128xf32>
    %144 = arith.mulf %134, %143 : vector<8x128xf32>
    %c0_74 = arith.constant 0 : index
    %c0_75 = arith.constant 0 : index
    %145 = vector.load %arg23[%c0_74, %c0_75] : memref<1x128xf32, #tpu.memory_space<vmem>>, vector<1x128xf32>
    %146 = vector.broadcast %145 : vector<1x128xf32> to vector<8x128xf32>
    %147 = arith.mulf %144, %146 : vector<8x128xf32>
    %c0_76 = arith.constant 0 : index
    %c0_77 = arith.constant 0 : index
    %148 = vector.load %arg24[%c0_76, %c0_77] : memref<1x128xf32, #tpu.memory_space<vmem>>, vector<1x128xf32>
    %149 = vector.broadcast %148 : vector<1x128xf32> to vector<8x128xf32>
    %150 = arith.addf %147, %149 : vector<8x128xf32>
    %151 = tpu.iota {dimensions = array<i32: 1>} : vector<1x128xi32>
    %c2_i32_78 = arith.constant 2 : i32
    %152 = vector.broadcast %c2_i32_78 : i32 to vector<1x128xi32>
    %153 = arith.cmpi slt, %151, %152 : vector<1x128xi32>
    %cst_79 = arith.constant -1.000000e+30 : f32
    %154 = vector.shape_cast %153 : vector<1x128xi1> to vector<1x128xi1>
    %155 = vector.broadcast %154 : vector<1x128xi1> to vector<8x128xi1>
    %156 = vector.broadcast %cst_79 : f32 to vector<8x128xf32>
    %157 = arith.select %155, %150, %156 : vector<8x128xi1>, vector<8x128xf32>
    %cst_80 = arith.constant dense<0xFF800000> : vector<8xf32>
    %158 = vector.multi_reduction <maximumf>, %157, %cst_80 [1] : vector<8x128xf32> to vector<8xf32>
    %159 = vector.shape_cast %158 : vector<8xf32> to vector<8x1xf32>
    %160 = vector.broadcast %159 : vector<8x1xf32> to vector<8x128xf32>
    %161 = arith.subf %157, %160 : vector<8x128xf32>
    %162 = math.exp %161 : vector<8x128xf32>
    %cst_81 = arith.constant 0.000000e+00 : f32
    %163 = vector.shape_cast %153 : vector<1x128xi1> to vector<1x128xi1>
    %164 = vector.broadcast %163 : vector<1x128xi1> to vector<8x128xi1>
    %165 = vector.broadcast %cst_81 : f32 to vector<8x128xf32>
    %166 = arith.select %164, %162, %165 : vector<8x128xi1>, vector<8x128xf32>
    %cst_82 = arith.constant dense<0.000000e+00> : vector<8xf32>
    %167 = vector.multi_reduction <add>, %166, %cst_82 [1] : vector<8x128xf32> to vector<8xf32>
    %168 = vector.shape_cast %167 : vector<8xf32> to vector<8x1xf32>
    %169 = vector.broadcast %168 : vector<8x1xf32> to vector<8x128xf32>
    %170 = arith.divf %166, %169 : vector<8x128xf32>
    %c0_83 = arith.constant 0 : index
    %c0_84 = arith.constant 0 : index
    %171 = vector.load %arg25[%c0_83, %c0_84] : memref<8x128xf32, #tpu.memory_space<vmem>>, vector<8x128xf32>
    tpu.vector_store %arg25[%c0_83, %c0_84], %170 {strides = array<i32>} : memref<8x128xf32, #tpu.memory_space<vmem>>, vector<8x128xf32>,
    return
  }
}

</mosaic_0001>

<bundles_post_ra>
// kernel: mlp_res_forward.1
= control target key start
LH: loop header
LB: loop body
LE: loop exit
PB: predicated region body
PF: predicated region fallthrough
CT: control target
= control target key end

     0   :  { %s4082_s0 = inlined_call_operand.vmem [shape: f32[8,128], index: 0, kind: input, shape index: {}]   ;;  %s4083_s1 = inlined_call_operand.hbm [shape: f32[128,384], index: 1, kind: input, shape index: {}]   ;;  %s4084_s2 = inlined_call_operand.hbm [shape: f32[1,384], index: 2, kind: input, shape index: {}]   ;;  %s4085_s3 = inlined_call_operand.hbm [shape: f32[384,640], index: 3, kind: input, shape index: {}]   ;;  %s4086_s4 = inlined_call_operand.vmem [shape: f32[1,640], index: 4, kind: input, shape index: {}]   ;;  %s4087_s5 = inlined_call_operand.hbm [shape: f32[128,640], index: 5, kind: input, shape index: {}]   ;;  %s4088_s6 = inlined_call_operand.vmem [shape: f32[1,640], index: 6, kind: input, shape index: {}]   ;;  %s4089_s7 = inlined_call_operand.vmem [shape: f32[1,640], index: 7, kind: input, shape index: {}]   ;;  %s4090_s8 = inlined_call_operand.vmem [shape: f32[1,640], index: 8, kind: input, shape index: {}]   ;;  %s4091_s9 = inlined_call_operand.hbm [shape: f32[640,128], index: 9, kind: input, shape index: {}]   ;;  %s4092_s10 = inlined_call_operand.vmem [shape: f32[1,128], index: 10, kind: input, shape index: {}]   ;;  %s4093_s11 = inlined_call_operand.hbm [shape: f32[128,128], index: 11, kind: input, shape index: {}]   ;;  %s4094_s12 = inlined_call_operand.vmem [shape: f32[1,128], index: 12, kind: input, shape index: {}]   ;;  %s4095_s13 = inlined_call_operand.hbm [shape: f32[640,128], index: 13, kind: input, shape index: {}]   ;;  %s4096_s14 = inlined_call_operand.vmem [shape: f32[1,128], index: 14, kind: input, shape index: {}]   ;;  %s4097_s15 = inlined_call_operand.vmem [shape: f32[1,128], index: 15, kind: input, shape index: {}]   ;;  %s4098_s16 = inlined_call_operand.vmem [shape: f32[1,128], index: 16, kind: input, shape index: {}]   ;;  %s4099_s17 = inlined_call_operand.hbm [shape: f32[128,128], index: 17, kind: input, shape index: {}]   ;;  %s4100_s18 = inlined_call_operand.vmem [shape: f32[1,128], index: 18, kind: input, shape index: {}]   ;;  %s4101_s19 = inlined_call_operand.hbm [shape: f32[128,128], index: 19, kind: input, shape index: {}]   ;;  %s4102_s20 = inlined_call_operand.vmem [shape: f32[1,128], index: 20, kind: input, shape index: {}]   ;;  %s4103_s21 = inlined_call_operand.hbm [shape: f32[128,128], index: 21, kind: input, shape index: {}]   ;;  %s4104_s22 = inlined_call_operand.vmem [shape: f32[1,128], index: 22, kind: input, shape index: {}]   ;;  %s4105_s23 = inlined_call_operand.vmem [shape: f32[1,128], index: 23, kind: input, shape index: {}]   ;;  %s4106_s24 = inlined_call_operand.vmem [shape: f32[1,128], index: 24, kind: input, shape index: {}]   ;;  %s4107_s25 = inlined_call_operand.vmem [shape: f32[8,128], index: 25, kind: output, shape index: {}]  }
   0x1   :  { %4112 = sst [smem:[#allocation24_spill]] %s4082_s0 }
   0x2   :  { %4113 = sst [smem:[#allocation25_spill]] %s4083_s1 }
   0x3   :  { %4114 = sst [smem:[#allocation26_spill]] %s4084_s2 }
   0x4   :  { %4115 = sst [smem:[#allocation27_spill]] %s4085_s3 }
   0x5   :  { %4116 = sst [smem:[#allocation28_spill]] %s4086_s4 }
   0x6   :  { %4117 = sst [smem:[#allocation29_spill]] %s4087_s5 }
   0x7   :  { %4118 = sst [smem:[#allocation30_spill]] %s4088_s6 }
   0x8   :  { %4119 = sst [smem:[#allocation31_spill]] %s4089_s7 }
   0x9   :  { %4120 = sst [smem:[#allocation32_spill]] %s4090_s8 }
   0xa   :  { %4121 = sst [smem:[#allocation33_spill]] %s4091_s9 }
   0xb   :  { %30 = vsyncpa [#allocation3], 0 }
   0xc   :  { %31 = vsyncpa [#allocation5], 0 }
   0xd   :  { %32 = vsyncpa [#allocation8], 0 }
   0xe   :  { %33 = vsyncpa [#allocation11], 0 }
   0xf   :  { %34 = vsyncpa [#allocation14], 0 }
  0x10   :  { %35 = vsyncpa [#allocation17], 0  ;;  %s3522_s29 = smov [#allocation4]  }
  0x11   :  { %s56_s2 = sshll.u32 %s3522_s29, 4  ;;  %s57_s2 = int_to_ptr.vmem [resolvable:$true] %s56_s2 }
  0x12   :  { %s3318_s6 = scalar_lea.vmem %s57_s2, 48  ;;  %s3322_s30 = scalar_lea.vmem %s57_s2, 64 }
  0x13   :  { %p3319_p0 = scmp.ne.s32.totalorder %s57_s2, %s3318_s6  ;;  %p3323_p1 = scmp.lt.s32.totalorder %s57_s2, %s57_s2 }
  0x14   :  { %p3324_p2 = scmp.lt.s32.totalorder %s3322_s30, %s3318_s6 }
  0x16   :  { %p3325_p3 = por %p3324_p2, %p3323_p1 }
  0x18   :  { %p3326_p4 = pnand %p3325_p3, %p3319_p0 }
  0x1a   :  { %3329 = shalt.err (!%p3326_p4)
}
  0x1b   :  { %s4122_s26 = sld [smem:[#allocation26_spill]]  ;;  %s3523_s1 = smov [#allocation7]  }
  0x1c   :  { %s79_s8 = sshll.u32 %s3523_s1, 4  ;;  %s80_s8 = int_to_ptr.vmem [resolvable:$true] %s79_s8 }
  0x1d   :  { %s3338_s27 = scalar_lea.vmem %s80_s8, 10240  ;;  %p3343_p6 = scmp.lt.s32.totalorder %s80_s8, %s80_s8 }
  0x1e   :  { %p3339_p5 = scmp.ne.s32.totalorder %s80_s8, %s3338_s27  ;;  %p3344_p7 = scmp.lt.s32.totalorder %s3338_s27, %s3338_s27 }
  0x20   :  { %p3345_p8 = por %p3344_p7, %p3343_p6 }
  0x21   :  { %59 = dma.hbm_to_vmem [thread:$0]  %s4122_s26, 48, %s57_s2, [#allocation5]  }
  0x22   :  { %p3346_p9 = pnand %p3345_p8, %p3339_p5 }
  0x24   :  { %3349 = shalt.err (!%p3346_p9)
}
  0x25   :  { %s4109_s4 = smov 640   ;;  %s3525_s28 = smov 40  }
  0x26   :  { %s4123_s0 = sld [smem:[#allocation29_spill]]  ;;  %s3526_s29 = smov [#allocation10]  }
  0x27   :  { %s111_s2 = sshll.u32 %s3526_s29, 4  ;;  %s3527_s6 = smov [#allocation13]   ;;  %s112_s2 = int_to_ptr.vmem [resolvable:$true] %s111_s2 }
  0x28   :  { %s143_s30 = sshll.u32 %s3527_s6, 4  ;;  %s3358_s7 = scalar_lea.vmem %s112_s2, 2048  ;;  %s144_s30 = int_to_ptr.vmem [resolvable:$true] %s143_s30 }
  0x29   :  { %p3359_p10 = scmp.ne.s32.totalorder %s112_s2, %s3358_s7  ;;  %p3363_p11 = scmp.lt.s32.totalorder %s112_s2, %s112_s2 }
  0x2a   :  { %p3364_p12 = scmp.lt.s32.totalorder %s3358_s7, %s3358_s7 }
  0x2c   :  { %85 = dma.hbm_to_vmem [thread:$0]  %s4123_s0, 10240, %s80_s8, [#allocation8], %s4109_s4, %s4109_s4, %s3525_s28  }
  0x2d   :  { %p3365_p13 = por %p3364_p12, %p3363_p11 }
  0x2f   :  { %p3366_p0 = pnand %p3365_p13, %p3359_p10 }
  0x31   :  { %3369 = shalt.err (!%p3366_p0)
}
  0x32   :  { %s4110_s3 = smov 128   ;;  %s3529_s26 = smov 8  }
  0x33   :  { %117 = dma.hbm_to_vmem [thread:$0]  %s4093_s11, 2048, %s112_s2, [#allocation11], %s4110_s3, %s4110_s3, %s3529_s26  }
  0x34   :  { %s3378_s27 = scalar_lea.vmem %s144_s30, 2048  ;;  %p3383_p2 = scmp.lt.s32.totalorder %s144_s30, %s144_s30 }
  0x35   :  { %p3379_p1 = scmp.ne.s32.totalorder %s144_s30, %s3378_s27  ;;  %p3384_p3 = scmp.lt.s32.totalorder %s3378_s27, %s3378_s27 }
  0x37   :  { %p3385_p4 = por %p3384_p3, %p3383_p2 }
  0x39   :  { %p3386_p5 = pnand %p3385_p4, %p3379_p1 }
  0x3b   :  { %3389 = shalt.err (!%p3386_p5)
}
  0x3c   :  { %149 = dma.hbm_to_vmem [thread:$0]  %s4099_s17, 2048, %s144_s30, [#allocation14], %s4110_s3, %s4110_s3, %s3529_s26  }
  0x3d   :  { %s3530_s0 = smov [#allocation2]  }
  0x3e   :  { %s43_s29 = sshll.u32 %s3530_s0, 4  ;;  %s44_s29 = int_to_ptr.vmem [resolvable:$true] %s43_s29 }
  0x3f   :  { %s3398_s6 = scalar_lea.vmem %s44_s29, 6144  ;;  %p3403_p7 = scmp.lt.s32.totalorder %s44_s29, %s44_s29 }
  0x40   :  { %p3399_p6 = scmp.ne.s32.totalorder %s44_s29, %s3398_s6  ;;  %p3404_p8 = scmp.lt.s32.totalorder %s3398_s6, %s3398_s6 }
  0x42   :  { %p3405_p9 = por %p3404_p8, %p3403_p7 }
  0x44   :  { %p3406_p10 = pnand %p3405_p9, %p3399_p6 }
  0x46   :  { %3409 = shalt.err (!%p3406_p10)
}
  0x47   :  { %s3531_s11 = smov 384   ;;  %s3532_s2 = smov 24  }
  0x48   :  { %s4124_s8 = sld [smem:[#allocation25_spill]]  ;;  %s3533_s27 = smov [#allocation6]  }
  0x49   :  { %s65_s4 = sshll.u32 %s3533_s27, 4  ;;  %s3534_s17 = smov [#allocation9]   ;;  %s66_s4 = int_to_ptr.vmem [resolvable:$true] %s65_s4 }
  0x4a   :  { %s97_s30 = sshll.u32 %s3534_s17, 4  ;;  %s3418_s9 = scalar_lea.vmem %s66_s4, 30720  ;;  %s98_s30 = int_to_ptr.vmem [resolvable:$true] %s97_s30 }
  0x4b   :  { %p3419_p11 = scmp.ne.s32.totalorder %s66_s4, %s3418_s9  ;;  %p3423_p12 = scmp.lt.s32.totalorder %s66_s4, %s66_s4 }
  0x4c   :  { %p3424_p13 = scmp.lt.s32.totalorder %s3418_s9, %s3418_s9 }
  0x4e   :  { %49 = dma.hbm_to_vmem [thread:$0]  %s4124_s8, 6144, %s44_s29, [#allocation3], %s3531_s11, %s3531_s11, %s3532_s2  }
  0x4f   :  { %p3425_p0 = por %p3424_p13, %p3423_p12 }
  0x51   :  { %p3426_p1 = pnand %p3425_p0, %p3419_p11 }
  0x53   :  { %3429 = shalt.err (!%p3426_p1)
}
  0x54   :  { %s4125_s5 = smov 640   ;;  %s4126_s3 = sld [smem:[#allocation27_spill]] }
  0x55   :  { %s3438_s29 = scalar_lea.vmem %s98_s30, 10240  ;;  %p3443_p3 = scmp.lt.s32.totalorder %s98_s30, %s98_s30 }
  0x56   :  { %p3439_p2 = scmp.ne.s32.totalorder %s98_s30, %s3438_s29  ;;  %p3444_p4 = scmp.lt.s32.totalorder %s3438_s29, %s3438_s29 }
  0x58   :  { %p3445_p5 = por %p3444_p4, %p3443_p3 }
  0x5a   :  { %71 = dma.hbm_to_vmem [thread:$0]  %s4126_s3, 30720, %s66_s4, [#allocation5], %s4125_s5, %s4125_s5, %s3525_s28  }
  0x5b   :  { %p3446_p6 = pnand %p3445_p5, %p3439_p2 }
  0x5d   :  { %3449 = shalt.err (!%p3446_p6)
}
  0x5e   :  { %s4127_s11 = smov 128   ;;  %s4128_s1 = sld [smem:[#allocation33_spill]] }
  0x5f   :  { %s3535_s8 = smov [#allocation12]   ;;  %s3536_s17 = smov [#allocation15]  }
  0x60   :  { %s125_s27 = sshll.u32 %s3535_s8, 4  ;;  %s157_s4 = sshll.u32 %s3536_s17, 4  ;;  %s126_s27 = int_to_ptr.vmem [resolvable:$true] %s125_s27  ;;  %s158_s4 = int_to_ptr.vmem [resolvable:$true] %s157_s4 }
  0x61   :  { %s3458_s28 = scalar_lea.vmem %s126_s27, 10240  ;;  %p3463_p8 = scmp.lt.s32.totalorder %s126_s27, %s126_s27 }
  0x62   :  { %p3459_p7 = scmp.ne.s32.totalorder %s126_s27, %s3458_s28  ;;  %p3464_p9 = scmp.lt.s32.totalorder %s3458_s28, %s3458_s28 }
  0x64   :  { %103 = dma.hbm_to_vmem [thread:$0]  %s4128_s1, 10240, %s98_s30, [#allocation8], %s4127_s11, %s4127_s11, %s3529_s26  }
  0x65   :  { %p3465_p10 = por %p3464_p9, %p3463_p8 }
  0x67   :  { %p3466_p11 = pnand %p3465_p10, %p3459_p7 }
  0x69   :  { %3469 = shalt.err (!%p3466_p11)
}
  0x6a   :  { %131 = dma.hbm_to_vmem [thread:$0]  %s4095_s13, 10240, %s126_s27, [#allocation11], %s4127_s11, %s4127_s11, %s3529_s26  }
  0x6b   :  { %s3478_s30 = scalar_lea.vmem %s158_s4, 2048  ;;  %p3483_p13 = scmp.lt.s32.totalorder %s158_s4, %s158_s4 }
  0x6c   :  { %p3479_p12 = scmp.ne.s32.totalorder %s158_s4, %s3478_s30  ;;  %p3484_p0 = scmp.lt.s32.totalorder %s3478_s30, %s3478_s30 }
  0x6e   :  { %p3485_p1 = por %p3484_p0, %p3483_p13 }
  0x70   :  { %p3486_p2 = pnand %p3485_p1, %p3479_p12 }
  0x72   :  { %3489 = shalt.err (!%p3486_p2)
}
  0x73   :  { %163 = dma.hbm_to_vmem [thread:$0]  %s4101_s19, 2048, %s158_s4, [#allocation14], %s4127_s11, %s4127_s11, %s3529_s26  }
  0x74   :  { %s3537_s6 = smov [#allocation16]  }
  0x75   :  { %s171_s29 = sshll.u32 %s3537_s6, 4  ;;  %s172_s29 = int_to_ptr.vmem [resolvable:$true] %s171_s29 }
  0x76   :  { %s3498_s2 = scalar_lea.vmem %s172_s29, 2048  ;;  %p3503_p4 = scmp.lt.s32.totalorder %s172_s29, %s172_s29 }
  0x77   :  { %p3499_p3 = scmp.ne.s32.totalorder %s172_s29, %s3498_s2  ;;  %p3504_p5 = scmp.lt.s32.totalorder %s3498_s2, %s3498_s2 }
  0x79   :  { %p3505_p6 = por %p3504_p5, %p3503_p4 }
  0x7b   :  { %p3506_p7 = pnand %p3505_p6, %p3499_p3 }
  0x7d   :  { %3509 = shalt.err (!%p3506_p7)
}
  0x7e   :  { %177 = dma.hbm_to_vmem [thread:$0]  %s4103_s21, 2048, %s172_s29, [#allocation17], %s4127_s11, %s4127_s11, %s3529_s26  }
  0x7f   :  { %3510 = dma.done.wait [#allocation3], 6144  }
  0x80   :  { %3511 = vsyncadd [#allocation3], 4294961152 }
  0x81   :  { %3512 = dma.done.wait [#allocation5], 30768  }
  0x82   :  { %3513 = vsyncadd [#allocation5], 4294936528 }
  0x83   :  { %3514 = dma.done.wait [#allocation8], 20480  }
  0x84   :  { %3515 = vsyncadd [#allocation8], 4294946816 }
  0x85   :  { %3516 = dma.done.wait [#allocation11], 12288  }
  0x86   :  { %3517 = vsyncadd [#allocation11], 4294955008 }
  0x87   :  { %3518 = dma.done.wait [#allocation14], 4096  }
  0x88   :  { %3519 = vsyncadd [#allocation14], 4294963200 }
  0x89   :  { %3520 = dma.done.wait [#allocation17], 2048  }
  0x8a   :  { %3521 = vsyncadd [#allocation17], 4294965248  ;;  %v3538_v0 = vmov 0.0   ;;  %vm3539_vm0 = vmmov 0   ;;  %v261_v1 = vld [vmem:[#allocation2 + $0x170] sm:$0xff]  ;;  %v262_v2 = vld [vmem:[#allocation2 + $0x178] sm:$0xff] }
  0x8b   :  { %2966 = vmatprep.subr.mxu1 %v3538_v0  ;;  %2998 = vmatprep.mubr.msk.f32.mxu1 %vm3539_vm0, %v3538_v0  ;;  %v260_v3 = vld [vmem:[#allocation2 + $0x168] sm:$0xff]  ;;  %v258_v4 = vld [vmem:[#allocation2 + $0x158] sm:$0xff]  ;;  %v259_v5 = vld [vmem:[#allocation2 + $0x160] sm:$0xff]  ;;  %s4129_s26 = sld [smem:[#allocation24_spill]] }
  0x8c   :  { %344 = vmatprep.mubr.f32.mxu0 %v3538_v0  ;;  %280 = vmatprep.subr.mxu0 %v261_v1  ;;  %v257_v6 = vld [vmem:[#allocation2 + $0x150] sm:$0xff]  ;;  %v255_v7 = vld [vmem:[#allocation2 + $0x140] sm:$0xff]  ;;  %v256_v8 = vld [vmem:[#allocation2 + $0x148] sm:$0xff]  ;;  %s4130_s17 = sld [smem:[#allocation28_spill]] }
  0x8d   :  { %2967 = vmatpush3.msra.mxu1 %v262_v2  ;;  %281 = vmatpush1.msra.mxu0 %v260_v3  ;;  %v254_v9 = vld [vmem:[#allocation2 + $0x138] sm:$0xff]  ;;  %v252_v10 = vld [vmem:[#allocation2 + $0x128] sm:$0xff]  ;;  %v253_v11 = vld [vmem:[#allocation2 + $0x130] sm:$0xff]  ;;  %s4131_s3 = sld [smem:[#allocation30_spill]] }
  0x8e   :  { %2968 = vmatprep.subr.mxu1 %v3538_v0  ;;  %282 = vmatprep.subr.mxu0 %v258_v4  ;;  %v251_v12 = vld [vmem:[#allocation2 + $0x120] sm:$0xff]  ;;  %v249_v13 = vld [vmem:[#allocation2 + $0x110] sm:$0xff]  ;;  %v250_v14 = vld [vmem:[#allocation2 + $0x118] sm:$0xff]  ;;  %s4132_s5 = sld [smem:[#allocation31_spill]] }
  0x8f   :  { %2969 = vmatpush3.msra.mxu1 %v259_v5  ;;  %283 = vmatpush1.msra.mxu0 %v257_v6  ;;  %v248_v15 = vld [vmem:[#allocation2 + $0x108] sm:$0xff]  ;;  %v246_v16 = vld [vmem:[#allocation2 + $0xf8] sm:$0xff]  ;;  %v247_v17 = vld [vmem:[#allocation2 + $0x100] sm:$0xff]  ;;  %s4133_s29 = sld [smem:[#allocation32_spill]] }
  0x90   :  { %2970 = vmatprep.subr.mxu1 %v3538_v0  ;;  %284 = vmatprep.subr.mxu0 %v255_v7  ;;  %v245_v18 = vld [vmem:[#allocation2 + $0xf0] sm:$0xff]  ;;  %v243_v19 = vld [vmem:[#allocation2 + $0xe0] sm:$0xff]  ;;  %v244_v20 = vld [vmem:[#allocation2 + $0xe8] sm:$0xff] }
  0x91   :  { %2971 = vmatpush3.msra.mxu1 %v256_v8  ;;  %285 = vmatpush1.msra.mxu0 %v254_v9  ;;  %v242_v21 = vld [vmem:[#allocation2 + $0xd8] sm:$0xff]  ;;  %v240_v22 = vld [vmem:[#allocation2 + $0xc8] sm:$0xff]  ;;  %v241_v23 = vld [vmem:[#allocation2 + $0xd0] sm:$0xff] }
  0x92   :  { %2972 = vmatprep.subr.mxu1 %v3538_v0  ;;  %286 = vmatprep.subr.mxu0 %v252_v10  ;;  %v239_v24 = vld [vmem:[#allocation2 + $0xc0] sm:$0xff]  ;;  %v237_v25 = vld [vmem:[#allocation2 + $0xb0] sm:$0xff]  ;;  %v238_v26 = vld [vmem:[#allocation2 + $0xb8] sm:$0xff] }
  0x93   :  { %2973 = vmatpush3.msra.mxu1 %v253_v11  ;;  %287 = vmatpush1.msra.mxu0 %v251_v12  ;;  %v236_v27 = vld [vmem:[#allocation2 + $0xa8] sm:$0xff]  ;;  %v234_v28 = vld [vmem:[#allocation2 + $0x98] sm:$0xff]  ;;  %v235_v29 = vld [vmem:[#allocation2 + $0xa0] sm:$0xff] }
  0x94   :  { %2974 = vmatprep.subr.mxu1 %v3538_v0  ;;  %288 = vmatprep.subr.mxu0 %v249_v13  ;;  %v233_v30 = vld [vmem:[#allocation2 + $0x90] sm:$0xff]  ;;  %v231_v31 = vld [vmem:[#allocation2 + $0x80] sm:$0xff]  ;;  %v232_v32 = vld [vmem:[#allocation2 + $0x88] sm:$0xff] }
  0x95   :  { %2975 = vmatpush3.msra.mxu1 %v250_v14  ;;  %289 = vmatpush1.msra.mxu0 %v248_v15  ;;  %v230_v33 = vld [vmem:[#allocation2 + $0x78] sm:$0xff]  ;;  %v228_v34 = vld [vmem:[#allocation2 + $0x68] sm:$0xff]  ;;  %v229_v35 = vld [vmem:[#allocation2 + $0x70] sm:$0xff] }
  0x96   :  { %2976 = vmatprep.subr.mxu1 %v3538_v0  ;;  %290 = vmatprep.subr.mxu0 %v246_v16  ;;  %v227_v36 = vld [vmem:[#allocation2 + $0x60] sm:$0xff]  ;;  %v225_v37 = vld [vmem:[#allocation2 + $0x50] sm:$0xff]  ;;  %v226_v38 = vld [vmem:[#allocation2 + $0x58] sm:$0xff] }
  0x97   :  { %2977 = vmatpush3.msra.mxu1 %v247_v17  ;;  %291 = vmatpush1.msra.mxu0 %v245_v18  ;;  %v224_v39 = vld [vmem:[#allocation2 + $0x48] sm:$0xff]  ;;  %v222_v40 = vld [vmem:[#allocation2 + $0x38] sm:$0xff]  ;;  %v223_v41 = vld [vmem:[#allocation2 + $0x40] sm:$0xff] }
  0x98   :  { %2978 = vmatprep.subr.mxu1 %v3538_v0  ;;  %292 = vmatprep.subr.mxu0 %v243_v19  ;;  %v221_v42 = vld [vmem:[#allocation2 + $0x30] sm:$0xff]  ;;  %v219_v43 = vld [vmem:[#allocation2 + $0x20] sm:$0xff]  ;;  %v220_v44 = vld [vmem:[#allocation2 + $0x28] sm:$0xff] }
  0x99   :  { %2979 = vmatpush3.msra.mxu1 %v244_v20  ;;  %293 = vmatpush1.msra.mxu0 %v242_v21  ;;  %v218_v45 = vld [vmem:[#allocation2 + $0x18] sm:$0xff]  ;;  %v216_v46 = vld [vmem:[#allocation2 + $0x8] sm:$0xff]  ;;  %v217_v47 = vld [vmem:[#allocation2 + $0x10] sm:$0xff] }
  0x9a   :  { %2980 = vmatprep.subr.mxu1 %v3538_v0  ;;  %294 = vmatprep.subr.mxu0 %v240_v22  ;;  %v215_v48 = vld [vmem:[#allocation2] sm:$0xff]  ;;  %v500_v55 = vld [vmem:[#allocation6 + $0x230] sm:$0xff]  ;;  %v495_v59 = vld [vmem:[#allocation6 + $0x208] sm:$0xff] }
  0x9b   :  { %2981 = vmatpush3.msra.mxu1 %v241_v23  ;;  %295 = vmatpush1.msra.mxu0 %v239_v24  ;;  %v214_v49 = vld [vmem:[%s4129_s26] sm:$0xff]  ;;  %v496_v57 = vld [vmem:[#allocation6 + $0x210] sm:$0xff]  ;;  %v491_v61 = vld [vmem:[#allocation6 + $0x1e8] sm:$0xff] }
  0x9c   :  { %2982 = vmatprep.subr.mxu1 %v3538_v0  ;;  %296 = vmatprep.subr.mxu0 %v237_v25  ;;  %v506_v50 = vld [vmem:[#allocation6 + $0x260] sm:$0xff]  ;;  %v505_v51 = vld [vmem:[#allocation6 + $0x258] sm:$0xff]  ;;  %v660_v58 = vld [vmem:[#allocation6 + $0x730] sm:$0xff] }
  0x9d   :  { %2983 = vmatpush3.msra.mxu1 %v238_v26  ;;  %297 = vmatpush1.msra.mxu0 %v236_v27  ;;  %v666_v52 = vld [vmem:[#allocation6 + $0x760] sm:$0xff]  ;;  %v501_v53 = vld [vmem:[#allocation6 + $0x238] sm:$0xff]  ;;  %v656_v60 = vld [vmem:[#allocation6 + $0x710] sm:$0xff] }
  0x9e   :  { %2984 = vmatprep.subr.mxu1 %v3538_v0  ;;  %298 = vmatprep.subr.mxu0 %v234_v28  ;;  %v665_v54 = vld [vmem:[#allocation6 + $0x758] sm:$0xff]  ;;  %v655_v62 = vld [vmem:[#allocation6 + $0x708] sm:$0xff]  ;;  %v490_v63 = vld [vmem:[#allocation6 + $0x1e0] sm:$0xff] }
  0x9f   :  { %2985 = vmatpush3.msra.mxu1 %v235_v29  ;;  %299 = vmatpush1.msra.mxu0 %v233_v30  ;;  %v661_v56 = vld [vmem:[#allocation6 + $0x738] sm:$0xff]  ;;  %v651_v1 = vld [vmem:[#allocation6 + $0x6e8] sm:$0xff]  ;;  %v486_v2 = vld [vmem:[#allocation6 + $0x1c0] sm:$0xff] }
  0xa0   :  { %2986 = vmatprep.subr.mxu1 %v3538_v0  ;;  %300 = vmatprep.subr.mxu0 %v231_v31  ;;  %v650_v3 = vld [vmem:[#allocation6 + $0x6e0] sm:$0xff]  ;;  %v485_v4 = vld [vmem:[#allocation6 + $0x1b8] sm:$0xff]  ;;  %v480_v8 = vld [vmem:[#allocation6 + $0x190] sm:$0xff] }
  0xa1   :  { %2987 = vmatpush3.msra.mxu1 %v232_v32  ;;  %301 = vmatpush1.msra.mxu0 %v230_v33  ;;  %v646_v5 = vld [vmem:[#allocation6 + $0x6c0] sm:$0xff]  ;;  %v481_v6 = vld [vmem:[#allocation6 + $0x198] sm:$0xff]  ;;  %v476_v10 = vld [vmem:[#allocation6 + $0x170] sm:$0xff] }
  0xa2   :  { %2988 = vmatprep.subr.mxu1 %v3538_v0  ;;  %302 = vmatprep.subr.mxu0 %v228_v34  ;;  %v645_v7 = vld [vmem:[#allocation6 + $0x6b8] sm:$0xff]  ;;  %v640_v11 = vld [vmem:[#allocation6 + $0x690] sm:$0xff]  ;;  %v475_v12 = vld [vmem:[#allocation6 + $0x168] sm:$0xff] }
  0xa3   :  { %2989 = vmatpush3.msra.mxu1 %v229_v35  ;;  %303 = vmatpush1.msra.mxu0 %v227_v36  ;;  %v641_v9 = vld [vmem:[#allocation6 + $0x698] sm:$0xff]  ;;  %v636_v13 = vld [vmem:[#allocation6 + $0x670] sm:$0xff]  ;;  %v471_v14 = vld [vmem:[#allocation6 + $0x148] sm:$0xff] }
  0xa4   :  { %2990 = vmatprep.subr.mxu1 %v3538_v0  ;;  %304 = vmatprep.subr.mxu0 %v225_v37  ;;  %v635_v15 = vld [vmem:[#allocation6 + $0x668] sm:$0xff]  ;;  %v470_v16 = vld [vmem:[#allocation6 + $0x140] sm:$0xff]  ;;  %v465_v20 = vld [vmem:[#allocation6 + $0x118] sm:$0xff] }
  0xa5   :  { %2991 = vmatpush3.msra.mxu1 %v226_v38  ;;  %305 = vmatpush1.msra.mxu0 %v224_v39  ;;  %v631_v17 = vld [vmem:[#allocation6 + $0x648] sm:$0xff]  ;;  %v466_v18 = vld [vmem:[#allocation6 + $0x120] sm:$0xff]  ;;  %v461_v22 = vld [vmem:[#allocation6 + $0xf8] sm:$0xff] }
  0xa6   :  { %2992 = vmatprep.subr.mxu1 %v3538_v0  ;;  %306 = vmatprep.subr.mxu0 %v222_v40  ;;  %v630_v19 = vld [vmem:[#allocation6 + $0x640] sm:$0xff]  ;;  %v625_v23 = vld [vmem:[#allocation6 + $0x618] sm:$0xff]  ;;  %v460_v24 = vld [vmem:[#allocation6 + $0xf0] sm:$0xff] }
  0xa7   :  { %2993 = vmatpush3.msra.mxu1 %v223_v41  ;;  %307 = vmatpush1.msra.mxu0 %v221_v42  ;;  %v626_v21 = vld [vmem:[#allocation6 + $0x620] sm:$0xff]  ;;  %v621_v25 = vld [vmem:[#allocation6 + $0x5f8] sm:$0xff]  ;;  %v456_v26 = vld [vmem:[#allocation6 + $0xd0] sm:$0xff] }
  0xa8   :  { %2994 = vmatprep.subr.mxu1 %v3538_v0  ;;  %308 = vmatprep.subr.mxu0 %v219_v43  ;;  %v620_v27 = vld [vmem:[#allocation6 + $0x5f0] sm:$0xff]  ;;  %v455_v28 = vld [vmem:[#allocation6 + $0xc8] sm:$0xff]  ;;  %v450_v32 = vld [vmem:[#allocation6 + $0xa0] sm:$0xff] }
  0xa9   :  { %2995 = vmatpush3.msra.mxu1 %v220_v44  ;;  %309 = vmatpush1.msra.mxu0 %v218_v45  ;;  %v616_v29 = vld [vmem:[#allocation6 + $0x5d0] sm:$0xff]  ;;  %v451_v30 = vld [vmem:[#allocation6 + $0xa8] sm:$0xff]  ;;  %v446_v34 = vld [vmem:[#allocation6 + $0x80] sm:$0xff] }
  0xaa   :  { %2996 = vmatprep.subr.mxu1 %v3538_v0  ;;  %310 = vmatprep.subr.mxu0 %v216_v46  ;;  %v615_v31 = vld [vmem:[#allocation6 + $0x5c8] sm:$0xff]  ;;  %v610_v35 = vld [vmem:[#allocation6 + $0x5a0] sm:$0xff]  ;;  %v445_v36 = vld [vmem:[#allocation6 + $0x78] sm:$0xff] }
  0xab   :  { %2997 = vmatpush3.msra.mxu1 %v217_v47  ;;  %311 = vmatpush1.msra.mxu0 %v215_v48  ;;  %v611_v33 = vld [vmem:[#allocation6 + $0x5a8] sm:$0xff]  ;;  %v606_v37 = vld [vmem:[#allocation6 + $0x580] sm:$0xff]  ;;  %v441_v38 = vld [vmem:[#allocation6 + $0x58] sm:$0xff] }
  0xac   :  { %2999 = vmatmul.mubr.f32.vlgmr.msra.gmra.mxu1 %v214_v49  ;;  %345 = vmatmul.mubr.f32.vlgmr.msra.gmra.mxu0 %v214_v49  ;;  %v605_v39 = vld [vmem:[#allocation6 + $0x578] sm:$0xff]  ;;  %v440_v40 = vld [vmem:[#allocation6 + $0x50] sm:$0xff]  ;;  %v435_v43 = vld [vmem:[#allocation6 + $0x28] sm:$0xff] }
  0xad   :  { %697 = vmatprep.subr.mxu0 %v506_v50  ;;  %768 = vmatprep.subr.mxu1 %v666_v52  ;;  %v601_v41 = vld [vmem:[#allocation6 + $0x558] sm:$0xff]  ;;  %v436_v42 = vld [vmem:[#allocation6 + $0x30] sm:$0xff]  ;;  %v431_v44 = vld [vmem:[#allocation6 + $0x8] sm:$0xff] }
  0xae   :  { %698 = vmatpush1.msra.mxu0 %v505_v51  ;;  %769 = vmatpush1.msra.mxu1 %v665_v54  ;;  %v430_v45 = vld [vmem:[#allocation6] sm:$0xff]  ;;  %v585_v47 = vld [vmem:[#allocation6 + $0x4d8] sm:$0xff]  ;;  %v580_v49 = vld [vmem:[#allocation6 + $0x4b0] sm:$0xff] }
  0xaf   :  { %699 = vmatprep.subr.mxu0 %v501_v53  ;;  %770 = vmatprep.subr.mxu1 %v661_v56  ;;  %v586_v46 = vld [vmem:[#allocation6 + $0x4e0] sm:$0xff]  ;;  %v581_v48 = vld [vmem:[#allocation6 + $0x4b8] sm:$0xff]  ;;  %v576_v50 = vld [vmem:[#allocation6 + $0x490] sm:$0xff] }
  0xb0   :  { %700 = vmatpush1.msra.mxu0 %v500_v55  ;;  %771 = vmatpush1.msra.mxu1 %v660_v58  ;;  %v575_v51 = vld [vmem:[#allocation6 + $0x488] sm:$0xff]  ;;  %v570_v53 = vld [vmem:[#allocation6 + $0x460] sm:$0xff]  ;;  %v565_v55 = vld [vmem:[#allocation6 + $0x438] sm:$0xff] }
  0xb1   :  { %701 = vmatprep.subr.mxu0 %v496_v57  ;;  %772 = vmatprep.subr.mxu1 %v656_v60  ;;  %v571_v52 = vld [vmem:[#allocation6 + $0x468] sm:$0xff]  ;;  %v566_v54 = vld [vmem:[#allocation6 + $0x440] sm:$0xff]  ;;  %v561_v56 = vld [vmem:[#allocation6 + $0x418] sm:$0xff] }
  0xb2   :  { %702 = vmatpush1.msra.mxu0 %v495_v59  ;;  %773 = vmatpush1.msra.mxu1 %v655_v62  ;;  %v560_v57 = vld [vmem:[#allocation6 + $0x410] sm:$0xff]  ;;  %v555_v59 = vld [vmem:[#allocation6 + $0x3e8] sm:$0xff]  ;;  %v546_v62 = vld [vmem:[#allocation6 + $0x3a0] sm:$0xff] }
  0xb3   :  { %703 = vmatprep.subr.mxu0 %v491_v61  ;;  %774 = vmatprep.subr.mxu1 %v651_v1  ;;  %v556_v58 = vld [vmem:[#allocation6 + $0x3f0] sm:$0xff]  ;;  %v551_v60 = vld [vmem:[#allocation6 + $0x3c8] sm:$0xff]  ;;  %v550_v61 = vld [vmem:[#allocation6 + $0x3c0] sm:$0xff] }
  0xb4   :  { %704 = vmatpush1.msra.mxu0 %v490_v63  ;;  %775 = vmatpush1.msra.mxu1 %v650_v3  ;;  %v545_v63 = vld [vmem:[#allocation6 + $0x398] sm:$0xff]  ;;  %v536_v3 = vld [vmem:[#allocation6 + $0x350] sm:$0xff] }
  0xb5   :  { %705 = vmatprep.subr.mxu0 %v486_v2  ;;  %776 = vmatprep.subr.mxu1 %v646_v5  ;;  %v541_v1 = vld [vmem:[#allocation6 + $0x378] sm:$0xff]  ;;  %v540_v2 = vld [vmem:[#allocation6 + $0x370] sm:$0xff]  ;;  %v531_v5 = vld [vmem:[#allocation6 + $0x328] sm:$0xff] }
  0xb6   :  { %706 = vmatpush1.msra.mxu0 %v485_v4  ;;  %777 = vmatpush1.msra.mxu1 %v645_v7  ;;  %v535_v4 = vld [vmem:[#allocation6 + $0x348] sm:$0xff]  ;;  %v600_v7 = vld [vmem:[#allocation6 + $0x550] sm:$0xff] }
  0xb7   :  { %707 = vmatprep.subr.mxu0 %v481_v6  ;;  %778 = vmatprep.subr.mxu1 %v641_v9  ;;  %v530_v6 = vld [vmem:[#allocation6 + $0x320] sm:$0xff]  ;;  %v596_v9 = vld [vmem:[#allocation6 + $0x530] sm:$0xff] }
  0xb8   :  { %708 = vmatpush1.msra.mxu0 %v480_v8  ;;  %779 = vmatpush1.msra.mxu1 %v640_v11  ;;  %v526_v8 = vld [vmem:[#allocation6 + $0x300] sm:$0xff]  ;;  %v595_v11 = vld [vmem:[#allocation6 + $0x528] sm:$0xff] }
  0xb9   :  { %709 = vmatprep.subr.mxu0 %v476_v10  ;;  %780 = vmatprep.subr.mxu1 %v636_v13  ;;  %v525_v10 = vld [vmem:[#allocation6 + $0x2f8] sm:$0xff]  ;;  %v591_v13 = vld [vmem:[#allocation6 + $0x508] sm:$0xff] }
  0xba   :  { %710 = vmatpush1.msra.mxu0 %v475_v12  ;;  %781 = vmatpush1.msra.mxu1 %v635_v15  ;;  %v521_v12 = vld [vmem:[#allocation6 + $0x2d8] sm:$0xff]  ;;  %v590_v15 = vld [vmem:[#allocation6 + $0x500] sm:$0xff] }
  0xbb   :  { %711 = vmatprep.subr.mxu0 %v471_v14  ;;  %782 = vmatprep.subr.mxu1 %v631_v17  ;;  %v520_v14 = vld [vmem:[#allocation6 + $0x2d0] sm:$0xff] }
  0xbc   :  { %712 = vmatpush1.msra.mxu0 %v470_v16  ;;  %783 = vmatpush1.msra.mxu1 %v630_v19  ;;  %v516_v16 = vld [vmem:[#allocation6 + $0x2b0] sm:$0xff]  ;;  %v511_v19 = vld [vmem:[#allocation6 + $0x288] sm:$0xff] }
  0xbd   :  { %713 = vmatprep.subr.mxu0 %v466_v18  ;;  %784 = vmatprep.subr.mxu1 %v626_v21  ;;  %v508_v17 = vld [vmem:[#allocation6 + $0x270] sm:$0xff]  ;;  %v515_v18 = vld [vmem:[#allocation6 + $0x2a8] sm:$0xff] }
  0xbe   :  { %714 = vmatpush1.msra.mxu0 %v465_v20  ;;  %785 = vmatpush1.msra.mxu1 %v625_v23  ;;  %v510_v20 = vld [vmem:[#allocation6 + $0x280] sm:$0xff]  ;;  %v668_v21 = vld [vmem:[#allocation6 + $0x770] sm:$0xff] }
  0xbf   :  { %715 = vmatprep.subr.mxu0 %v461_v22  ;;  %786 = vmatprep.subr.mxu1 %v621_v25  ;;  %v265_v22 = vlaneseq  ;;  %v263_v25 = vld [vmem:[#allocation4] sm:$0x7] }
  0xc0   :  { %716 = vmatpush1.msra.mxu0 %v460_v24  ;;  %787 = vmatpush1.msra.mxu1 %v620_v27 }
  0xc1   :  { %717 = vmatprep.subr.mxu0 %v456_v26  ;;  %788 = vmatprep.subr.mxu1 %v616_v29  ;;  %v3748_v23 = vshrl.u32 %v265_v22, 7 }
  0xc2   :  { %718 = vmatpush1.msra.mxu0 %v455_v28  ;;  %789 = vmatpush1.msra.mxu1 %v615_v31 }
  0xc3   :  { %719 = vmatprep.subr.mxu0 %v451_v30  ;;  %790 = vmatprep.subr.mxu1 %v611_v33  ;;  %v3751_v24 = vsub.s32 2, %v3748_v23  ;;  %v3754_v26 = vsub.s32 0, %v3748_v23  ;;  %v3757_v27 = vsub.s32 1, %v3748_v23 }
  0xc4   :  { %720 = vmatpush1.msra.mxu0 %v450_v32  ;;  %791 = vmatpush1.msra.mxu1 %v610_v35 }
  0xc5   :  { %721 = vmatprep.subr.mxu0 %v446_v34  ;;  %792 = vmatprep.subr.mxu1 %v606_v37  ;;  %v276_v28 = vrot.slane %v263_v25, %v3751_v24  ;;  %v268_v29 = vrot.slane %v263_v25, %v3754_v26  ;;  %v272_v31 = vrot.slane %v263_v25, %v3757_v27  ;;  %v622_v25 = vld [vmem:[#allocation6 + $0x600] sm:$0xff] }
  0xc6   :  { %722 = vmatpush1.msra.mxu0 %v445_v36  ;;  %793 = vmatpush1.msra.mxu1 %v605_v39  ;;  %v507_v39 = vld [vmem:[#allocation6 + $0x268] sm:$0xff] }
  0xc7   :  { %723 = vmatprep.subr.mxu0 %v441_v38  ;;  %794 = vmatprep.subr.mxu1 %v601_v41  ;;  %v503_v41 = vld [vmem:[#allocation6 + $0x248] sm:$0xff] }
  0xc8   :  { %724 = vmatpush1.msra.mxu0 %v440_v40  ;;  %832 = vmatprep.mubr.f32.mxu1 %v3538_v0 }
  0xc9   :  { %725 = vmatprep.subr.mxu0 %v436_v42  ;;  %795 = vmatpush1.msra.mxu1 %v600_v7  ;;  %v468_v7 = vld [vmem:[#allocation6 + $0x130] sm:$0xff] }
  0xca   :  { %726 = vmatpush1.msra.mxu0 %v435_v43  ;;  %796 = vmatprep.subr.mxu1 %v596_v9  ;;  %v467_v9 = vld [vmem:[#allocation6 + $0x128] sm:$0xff] }
  0xcb   :  { %727 = vmatprep.subr.mxu0 %v431_v44  ;;  %797 = vmatpush1.msra.mxu1 %v595_v11  ;;  %v502_v44 = vld [vmem:[#allocation6 + $0x240] sm:$0xff]  ;;  %v463_v11 = vld [vmem:[#allocation6 + $0x108] sm:$0xff] }
  0xcc   :  { %728 = vmatpush1.msra.mxu0 %v430_v45  ;;  %798 = vmatprep.subr.mxu1 %v591_v13  ;;  %v498_v45 = vld [vmem:[#allocation6 + $0x220] sm:$0xff] }
  0xcd   :  { %729 = vmatprep.subr.mxu0 %v586_v46  ;;  %799 = vmatpush1.msra.mxu1 %v590_v15  ;;  %v462_v13 = vld [vmem:[#allocation6 + $0x100] sm:$0xff] }
  0xce   :  { %730 = vmatpush2.msra.mxu0 %v585_v47  ;;  %839 = vmatprep.subr.mxu1 %v508_v17  ;;  %v497_v47 = vld [vmem:[#allocation6 + $0x218] sm:$0xff]  ;;  %v458_v15 = vld [vmem:[#allocation6 + $0xe0] sm:$0xff] }
  0xcf   :  { %731 = vmatprep.subr.mxu0 %v581_v48  ;;  %v667_v48 = vld [vmem:[#allocation6 + $0x768] sm:$0xff]  ;;  %v457_v17 = vld [vmem:[#allocation6 + $0xd8] sm:$0xff] }
  0xd0   :  { %732 = vmatpush2.msra.mxu0 %v580_v49  ;;  %v493_v49 = vld [vmem:[#allocation6 + $0x1f8] sm:$0xff] }
  0xd1   :  { %733 = vmatprep.subr.mxu0 %v576_v50 }
  0xd2   :  { %734 = vmatpush2.msra.mxu0 %v575_v51  ;;  %v663_v51 = vld [vmem:[#allocation6 + $0x748] sm:$0xff] }
  0xd3   :  { %735 = vmatprep.subr.mxu0 %v571_v52  ;;  %v492_v52 = vld [vmem:[#allocation6 + $0x1f0] sm:$0xff] }
  0xd4   :  { %736 = vmatpush2.msra.mxu0 %v570_v53  ;;  %v662_v53 = vld [vmem:[#allocation6 + $0x740] sm:$0xff] }
  0xd5   :  { %737 = vmatprep.subr.mxu0 %v566_v54  ;;  %v488_v54 = vld [vmem:[#allocation6 + $0x1d0] sm:$0xff] }
  0xd6   :  { %738 = vmatpush2.msra.mxu0 %v565_v55  ;;  %v658_v55 = vld [vmem:[#allocation6 + $0x720] sm:$0xff] }
  0xd7   :  { %739 = vmatprep.subr.mxu0 %v561_v56  ;;  %v487_v56 = vld [vmem:[#allocation6 + $0x1c8] sm:$0xff] }
  0xd8   :  { %740 = vmatpush2.msra.mxu0 %v560_v57  ;;  %v657_v57 = vld [vmem:[#allocation6 + $0x718] sm:$0xff] }
  0xd9   :  { %741 = vmatprep.subr.mxu0 %v556_v58  ;;  %v483_v58 = vld [vmem:[#allocation6 + $0x1a8] sm:$0xff] }
  0xda   :  { %742 = vmatpush2.msra.mxu0 %v555_v59  ;;  %v653_v59 = vld [vmem:[#allocation6 + $0x6f8] sm:$0xff] }
  0xdb   :  { %743 = vmatprep.subr.mxu0 %v551_v60  ;;  %v482_v60 = vld [vmem:[#allocation6 + $0x1a0] sm:$0xff] }
  0xdc   :  { %744 = vmatpush2.msra.mxu0 %v550_v61  ;;  %v652_v61 = vld [vmem:[#allocation6 + $0x6f0] sm:$0xff] }
  0xdd   :  { %745 = vmatprep.subr.mxu0 %v546_v62  ;;  %v478_v62 = vld [vmem:[#allocation6 + $0x180] sm:$0xff] }
  0xde   :  { %746 = vmatpush2.msra.mxu0 %v545_v63  ;;  %v648_v63 = vld [vmem:[#allocation6 + $0x6d0] sm:$0xff] }
  0xdf   :  { %747 = vmatprep.subr.mxu0 %v541_v1  ;;  %v477_v1 = vld [vmem:[#allocation6 + $0x178] sm:$0xff] }
  0xe0   :  { %748 = vmatpush2.msra.mxu0 %v540_v2  ;;  %v647_v2 = vld [vmem:[#allocation6 + $0x6c8] sm:$0xff] }
  0xe1   :  { %749 = vmatprep.subr.mxu0 %v536_v3  ;;  %v473_v3 = vld [vmem:[#allocation6 + $0x158] sm:$0xff] }
  0xe2   :  { %750 = vmatpush2.msra.mxu0 %v535_v4  ;;  %v643_v4 = vld [vmem:[#allocation6 + $0x6a8] sm:$0xff] }
  0xe3   :  { %751 = vmatprep.subr.mxu0 %v531_v5  ;;  %v472_v5 = vld [vmem:[#allocation6 + $0x150] sm:$0xff] }
  0xe4   :  { %752 = vmatpush2.msra.mxu0 %v530_v6  ;;  %v642_v6 = vld [vmem:[#allocation6 + $0x6a0] sm:$0xff] }
  0xe5   :  { %753 = vmatprep.subr.mxu0 %v526_v8  ;;  %v638_v8 = vld [vmem:[#allocation6 + $0x680] sm:$0xff] }
  0xe6   :  { %754 = vmatpush2.msra.mxu0 %v525_v10  ;;  %v637_v10 = vld [vmem:[#allocation6 + $0x678] sm:$0xff] }
  0xe7   :  { %755 = vmatprep.subr.mxu0 %v521_v12  ;;  %v633_v12 = vld [vmem:[#allocation6 + $0x658] sm:$0xff] }
  0xe8   :  { %756 = vmatpush2.msra.mxu0 %v520_v14  ;;  %v632_v14 = vld [vmem:[#allocation6 + $0x650] sm:$0xff] }
  0xe9   :  { %757 = vmatprep.subr.mxu0 %v516_v16  ;;  %v628_v16 = vld [vmem:[#allocation6 + $0x630] sm:$0xff] }
  0xea   :  { %758 = vmatpush2.msra.mxu0 %v515_v18  ;;  %v627_v18 = vld [vmem:[#allocation6 + $0x628] sm:$0xff] }
  0xeb   :  { %759 = vmatprep.subr.mxu0 %v511_v19  ;;  %v453_v19 = vld [vmem:[#allocation6 + $0xb8] sm:$0xff] }
  0xec   :  { %760 = vmatpush2.msra.mxu0 %v510_v20  ;;  %v623_v20 = vld [vmem:[#allocation6 + $0x608] sm:$0xff] }
  0xed   :  { %910 = vmatprep.subr.mxu0 %v668_v21  ;;  %v452_v21 = vld [vmem:[#allocation6 + $0xb0] sm:$0xff] }
 0x16c   :  { %v417_v30 = vpop.f32.mrf.mxu1  ;;  %v346_v33 = vpop.f32.mrf.mxu0 }
 0x16d   :  { %v418_v32 = vadd.f32 %v417_v30, %v276_v28  ;;  %v347_v34 = vadd.f32 %v346_v33, %v268_v29  ;;  %v448_v28 = vld [vmem:[#allocation6 + $0x90] sm:$0xff]  ;;  %v618_v29 = vld [vmem:[#allocation6 + $0x5e0] sm:$0xff]  ;;  %v447_v30 = vld [vmem:[#allocation6 + $0x88] sm:$0xff] }
 0x16e   :  { %v3000_v35 = vpop.f32.mrf.mxu1  ;;  %v348_v37 = vpop.f32.mrf.mxu0  ;;  %v613_v33 = vld [vmem:[#allocation6 + $0x5b8] sm:$0xff] }
 0x16f   :  { %vm423_vm1 = vcmp.ge.f32.partialorder %v418_v32, 0.0  ;;  %v426_v36 = vmul.f32 0.01, %v418_v32  ;;  %v349_v38 = vadd.f32 %v348_v37, %v272_v31  ;;  %v424_v42 = vmul.f32 0.01, %v347_v34  ;;  %v617_v31 = vld [vmem:[#allocation6 + $0x5d8] sm:$0xff] }
 0x170   :  { %vm421_vm3 = vcmp.ge.f32.partialorder %v347_v34, 0.0  ;;  %v612_v35 = vld [vmem:[#allocation6 + $0x5b0] sm:$0xff] }
 0x171   :  { %v3762_v40 = vsel %vm423_vm1, %v418_v32, %v426_v36  ;;  %v425_v43 = vmul.f32 0.01, %v349_v38  ;;  %vm422_vm2 = vcmp.ge.f32.partialorder %v349_v38, 0.0  ;;  %v3769_v50 = vsel %vm421_vm3, %v347_v34, %v424_v42  ;;  %v443_v32 = vld [vmem:[#allocation6 + $0x68] sm:$0xff]  ;;  %v442_v34 = vld [vmem:[#allocation6 + $0x60] sm:$0xff]  ;;  %v608_v37 = vld [vmem:[#allocation6 + $0x590] sm:$0xff] }
 0x172   :  { %833 = vmatmul.mubr.f32.vlgmr.msra.gmra.mxu1 %v3762_v40  ;;  %v438_v36 = vld [vmem:[#allocation6 + $0x40] sm:$0xff]  ;;  %v603_v42 = vld [vmem:[#allocation6 + $0x568] sm:$0xff] }
 0x173   :  { %840 = vmatpush1.msra.mxu1 %v507_v39  ;;  %v3765_v46 = vsel %vm422_vm2, %v349_v38, %v425_v43  ;;  %v437_v38 = vld [vmem:[#allocation6 + $0x38] sm:$0xff]  ;;  %v607_v39 = vld [vmem:[#allocation6 + $0x588] sm:$0xff]  ;;  %v432_v43 = vld [vmem:[#allocation6 + $0x10] sm:$0xff] }
 0x174   :  { %841 = vmatprep.subr.mxu1 %v503_v41  ;;  %761 = vmatprep.mubr.f32.mxu0 %v3765_v46  ;;  %v433_v41 = vld [vmem:[#allocation6 + $0x18] sm:$0xff] }
 0x175   :  { %842 = vmatpush1.msra.mxu1 %v502_v44  ;;  %903 = vmatprep.mubr.f32.mxu1 %v3765_v46  ;;  %v602_v44 = vld [vmem:[#allocation6 + $0x560] sm:$0xff] }
 0x176   :  { %843 = vmatprep.subr.mxu1 %v498_v45  ;;  %762 = vmatmul.mubr.f32.vlgmr.msra.gmra.mxu0 %v3769_v50  ;;  %v588_v45 = vld [vmem:[#allocation6 + $0x4f0] sm:$0xff] }
 0x177   :  { %844 = vmatpush1.msra.mxu1 %v497_v47  ;;  %911 = vmatpush1.msra.mxu0 %v667_v48  ;;  %v598_v47 = vld [vmem:[#allocation6 + $0x540] sm:$0xff]  ;;  %v587_v48 = vld [vmem:[#allocation6 + $0x4e8] sm:$0xff] }
 0x178   :  { %845 = vmatprep.subr.mxu1 %v493_v49  ;;  %912 = vmatprep.subr.mxu0 %v663_v51  ;;  %v597_v49 = vld [vmem:[#allocation6 + $0x538] sm:$0xff]  ;;  %v583_v51 = vld [vmem:[#allocation6 + $0x4c8] sm:$0xff] }
 0x179   :  { %846 = vmatpush1.msra.mxu1 %v492_v52  ;;  %913 = vmatpush1.msra.mxu0 %v662_v53  ;;  %v593_v52 = vld [vmem:[#allocation6 + $0x518] sm:$0xff]  ;;  %v582_v53 = vld [vmem:[#allocation6 + $0x4c0] sm:$0xff] }
 0x17a   :  { %847 = vmatprep.subr.mxu1 %v488_v54  ;;  %914 = vmatprep.subr.mxu0 %v658_v55  ;;  %v592_v54 = vld [vmem:[#allocation6 + $0x510] sm:$0xff]  ;;  %v578_v55 = vld [vmem:[#allocation6 + $0x4a0] sm:$0xff] }
 0x17b   :  { %848 = vmatpush1.msra.mxu1 %v487_v56  ;;  %915 = vmatpush1.msra.mxu0 %v657_v57  ;;  %v589_v56 = vld [vmem:[#allocation6 + $0x4f8] sm:$0xff] }
 0x17c   :  { %849 = vmatprep.subr.mxu1 %v483_v58  ;;  %916 = vmatprep.subr.mxu0 %v653_v59  ;;  %v577_v57 = vld [vmem:[#allocation6 + $0x498] sm:$0xff] }
 0x17d   :  { %850 = vmatpush1.msra.mxu1 %v482_v60  ;;  %917 = vmatpush1.msra.mxu0 %v652_v61  ;;  %v509_v58 = vld [vmem:[#allocation6 + $0x278] sm:$0xff]  ;;  %v584_v60 = vld [vmem:[#allocation6 + $0x4d0] sm:$0xff] }
 0x17e   :  { %851 = vmatprep.subr.mxu1 %v478_v62  ;;  %918 = vmatprep.subr.mxu0 %v648_v63  ;;  %v573_v59 = vld [vmem:[#allocation6 + $0x478] sm:$0xff]  ;;  %v572_v61 = vld [vmem:[#allocation6 + $0x470] sm:$0xff] }
 0x17f   :  { %852 = vmatpush1.msra.mxu1 %v477_v1  ;;  %919 = vmatpush1.msra.mxu0 %v647_v2  ;;  %v504_v62 = vld [vmem:[#allocation6 + $0x250] sm:$0xff]  ;;  %v579_v1 = vld [vmem:[#allocation6 + $0x4a8] sm:$0xff] }
 0x180   :  { %853 = vmatprep.subr.mxu1 %v473_v3  ;;  %920 = vmatprep.subr.mxu0 %v643_v4  ;;  %v568_v63 = vld [vmem:[#allocation6 + $0x450] sm:$0xff]  ;;  %v567_v2 = vld [vmem:[#allocation6 + $0x448] sm:$0xff] }
 0x181   :  { %854 = vmatpush1.msra.mxu1 %v472_v5  ;;  %921 = vmatpush1.msra.mxu0 %v642_v6  ;;  %v499_v3 = vld [vmem:[#allocation6 + $0x228] sm:$0xff]  ;;  %v574_v5 = vld [vmem:[#allocation6 + $0x480] sm:$0xff] }
 0x182   :  { %855 = vmatprep.subr.mxu1 %v468_v7  ;;  %922 = vmatprep.subr.mxu0 %v638_v8  ;;  %v563_v4 = vld [vmem:[#allocation6 + $0x428] sm:$0xff]  ;;  %v562_v6 = vld [vmem:[#allocation6 + $0x420] sm:$0xff] }
 0x183   :  { %856 = vmatpush1.msra.mxu1 %v467_v9  ;;  %923 = vmatpush1.msra.mxu0 %v637_v10  ;;  %v494_v7 = vld [vmem:[#allocation6 + $0x200] sm:$0xff]  ;;  %v569_v9 = vld [vmem:[#allocation6 + $0x458] sm:$0xff] }
 0x184   :  { %857 = vmatprep.subr.mxu1 %v463_v11  ;;  %924 = vmatprep.subr.mxu0 %v633_v12  ;;  %v558_v8 = vld [vmem:[#allocation6 + $0x400] sm:$0xff]  ;;  %v489_v10 = vld [vmem:[#allocation6 + $0x1d8] sm:$0xff]  ;;  %v564_v12 = vld [vmem:[#allocation6 + $0x430] sm:$0xff] }
 0x185   :  { %858 = vmatpush1.msra.mxu1 %v462_v13  ;;  %925 = vmatpush1.msra.mxu0 %v632_v14  ;;  %v553_v11 = vld [vmem:[#allocation6 + $0x3d8] sm:$0xff]  ;;  %v552_v13 = vld [vmem:[#allocation6 + $0x3d0] sm:$0xff] }
 0x186   :  { %859 = vmatprep.subr.mxu1 %v458_v15  ;;  %926 = vmatprep.subr.mxu0 %v628_v16  ;;  %v484_v14 = vld [vmem:[#allocation6 + $0x1b0] sm:$0xff]  ;;  %v559_v16 = vld [vmem:[#allocation6 + $0x408] sm:$0xff] }
 0x187   :  { %860 = vmatpush1.msra.mxu1 %v457_v17  ;;  %927 = vmatpush1.msra.mxu0 %v627_v18  ;;  %v548_v15 = vld [vmem:[#allocation6 + $0x3b0] sm:$0xff]  ;;  %v547_v17 = vld [vmem:[#allocation6 + $0x3a8] sm:$0xff] }
 0x188   :  { %861 = vmatprep.subr.mxu1 %v453_v19  ;;  %928 = vmatprep.subr.mxu0 %v623_v20  ;;  %v479_v18 = vld [vmem:[#allocation6 + $0x188] sm:$0xff]  ;;  %v554_v20 = vld [vmem:[#allocation6 + $0x3e0] sm:$0xff] }
 0x189   :  { %862 = vmatpush1.msra.mxu1 %v452_v21  ;;  %929 = vmatpush1.msra.mxu0 %v622_v25  ;;  %v543_v19 = vld [vmem:[#allocation6 + $0x388] sm:$0xff]  ;;  %v542_v21 = vld [vmem:[#allocation6 + $0x380] sm:$0xff] }
 0x18a   :  { %863 = vmatprep.subr.mxu1 %v448_v28  ;;  %930 = vmatprep.subr.mxu0 %v618_v29  ;;  %v474_v25 = vld [vmem:[#allocation6 + $0x160] sm:$0xff]  ;;  %v549_v29 = vld [vmem:[#allocation6 + $0x3b8] sm:$0xff] }
 0x18b   :  { %864 = vmatpush1.msra.mxu1 %v447_v30  ;;  %931 = vmatpush1.msra.mxu0 %v617_v31  ;;  %v538_v28 = vld [vmem:[#allocation6 + $0x360] sm:$0xff]  ;;  %v537_v30 = vld [vmem:[#allocation6 + $0x358] sm:$0xff] }
 0x18c   :  { %865 = vmatprep.subr.mxu1 %v443_v32  ;;  %932 = vmatprep.subr.mxu0 %v613_v33  ;;  %v469_v31 = vld [vmem:[#allocation6 + $0x138] sm:$0xff]  ;;  %v544_v33 = vld [vmem:[#allocation6 + $0x390] sm:$0xff] }
 0x18d   :  { %866 = vmatpush1.msra.mxu1 %v442_v34  ;;  %933 = vmatpush1.msra.mxu0 %v612_v35  ;;  %v533_v32 = vld [vmem:[#allocation6 + $0x338] sm:$0xff]  ;;  %v532_v34 = vld [vmem:[#allocation6 + $0x330] sm:$0xff] }
 0x18e   :  { %867 = vmatprep.subr.mxu1 %v438_v36  ;;  %934 = vmatprep.subr.mxu0 %v608_v37  ;;  %v464_v35 = vld [vmem:[#allocation6 + $0x110] sm:$0xff]  ;;  %v539_v37 = vld [vmem:[#allocation6 + $0x368] sm:$0xff] }
 0x18f   :  { %868 = vmatpush1.msra.mxu1 %v437_v38  ;;  %935 = vmatpush1.msra.mxu0 %v607_v39  ;;  %v528_v36 = vld [vmem:[#allocation6 + $0x310] sm:$0xff]  ;;  %v527_v38 = vld [vmem:[#allocation6 + $0x308] sm:$0xff] }
 0x190   :  { %869 = vmatprep.subr.mxu1 %v433_v41  ;;  %936 = vmatprep.subr.mxu0 %v603_v42  ;;  %v459_v39 = vld [vmem:[#allocation6 + $0xe8] sm:$0xff]  ;;  %v534_v42 = vld [vmem:[#allocation6 + $0x340] sm:$0xff] }
 0x191   :  { %870 = vmatpush1.msra.mxu1 %v432_v43  ;;  %937 = vmatpush1.msra.mxu0 %v602_v44  ;;  %v523_v41 = vld [vmem:[#allocation6 + $0x2e8] sm:$0xff]  ;;  %v522_v43 = vld [vmem:[#allocation6 + $0x2e0] sm:$0xff] }
 0x192   :  { %871 = vmatprep.subr.mxu1 %v588_v45  ;;  %938 = vmatprep.subr.mxu0 %v598_v47  ;;  %v454_v44 = vld [vmem:[#allocation6 + $0xc0] sm:$0xff]  ;;  %v529_v47 = vld [vmem:[#allocation6 + $0x318] sm:$0xff] }
 0x193   :  { %872 = vmatpush2.msra.mxu1 %v587_v48  ;;  %939 = vmatpush1.msra.mxu0 %v597_v49  ;;  %v518_v45 = vld [vmem:[#allocation6 + $0x2c0] sm:$0xff]  ;;  %v517_v48 = vld [vmem:[#allocation6 + $0x2b8] sm:$0xff] }
 0x194   :  { %873 = vmatprep.subr.mxu1 %v583_v51  ;;  %940 = vmatprep.subr.mxu0 %v593_v52  ;;  %v449_v49 = vld [vmem:[#allocation6 + $0x98] sm:$0xff]  ;;  %v524_v52 = vld [vmem:[#allocation6 + $0x2f0] sm:$0xff] }
 0x195   :  { %874 = vmatpush2.msra.mxu1 %v582_v53  ;;  %941 = vmatpush1.msra.mxu0 %v592_v54  ;;  %v513_v51 = vld [vmem:[#allocation6 + $0x298] sm:$0xff]  ;;  %v512_v53 = vld [vmem:[#allocation6 + $0x290] sm:$0xff] }
 0x196   :  { %974 = vmatprep.mubr.f32.mxu0 %v3538_v0  ;;  %875 = vmatprep.subr.mxu1 %v578_v55  ;;  %v444_v54 = vld [vmem:[#allocation6 + $0x70] sm:$0xff]  ;;  %v519_v55 = vld [vmem:[#allocation6 + $0x2c8] sm:$0xff] }
 0x197   :  { %975 = vmatmul.mubr.f32.vlgmr.msra.gmra.mxu0 %v3762_v40  ;;  %2655 = vmatprep.subr.mxu0 %v589_v56  ;;  %v439_v56 = vld [vmem:[#allocation6 + $0x48] sm:$0xff] }
 0x198   :  { %876 = vmatpush2.msra.mxu1 %v577_v57  ;;  %2656 = vmatpush3.msra.mxu0 %v509_v58  ;;  %v669_v57 = vld [vmem:[#allocation6 + $0x778] sm:$0xff]  ;;  %v514_v58 = vld [vmem:[#allocation6 + $0x2a0] sm:$0xff] }
 0x199   :  { %1045 = vmatprep.mubr.f32.mxu0 %v3765_v46  ;;  %877 = vmatprep.subr.mxu1 %v573_v59  ;;  %v557_v46 = vld [vmem:[#allocation6 + $0x3f8] sm:$0xff]  ;;  %v434_v59 = vld [vmem:[#allocation6 + $0x20] sm:$0xff] }
 0x19a   :  { %2657 = vmatprep.subr.mxu0 %v584_v60  ;;  %878 = vmatpush2.msra.mxu1 %v572_v61  ;;  %v664_v60 = vld [vmem:[#allocation6 + $0x750] sm:$0xff]  ;;  %v1197_v61 = vld [vmem:[#allocation7 + $0x260] sm:$0xff] }
 0x19b   :  { %2658 = vmatpush3.msra.mxu0 %v504_v62  ;;  %879 = vmatprep.subr.mxu1 %v568_v63  ;;  %v659_v62 = vld [vmem:[#allocation6 + $0x728] sm:$0xff]  ;;  %v1196_v63 = vld [vmem:[#allocation7 + $0x258] sm:$0xff] }
 0x19c   :  { %2659 = vmatprep.subr.mxu0 %v579_v1  ;;  %880 = vmatpush2.msra.mxu1 %v567_v2  ;;  %v1192_v1 = vld [vmem:[#allocation7 + $0x238] sm:$0xff]  ;;  %v654_v2 = vld [vmem:[#allocation6 + $0x700] sm:$0xff] }
 0x19d   :  { %2660 = vmatpush3.msra.mxu0 %v499_v3  ;;  %881 = vmatprep.subr.mxu1 %v563_v4  ;;  %v1191_v3 = vld [vmem:[#allocation7 + $0x230] sm:$0xff] }
 0x19e   :  { %2661 = vmatprep.subr.mxu0 %v574_v5  ;;  %882 = vmatpush2.msra.mxu1 %v562_v6  ;;  %v1187_v4 = vld [vmem:[#allocation7 + $0x210] sm:$0xff]  ;;  %v649_v5 = vld [vmem:[#allocation6 + $0x6d8] sm:$0xff]  ;;  %v1186_v6 = vld [vmem:[#allocation7 + $0x208] sm:$0xff] }
 0x19f   :  { %2662 = vmatpush3.msra.mxu0 %v494_v7  ;;  %883 = vmatprep.subr.mxu1 %v558_v8  ;;  %v1182_v7 = vld [vmem:[#allocation7 + $0x1e8] sm:$0xff]  ;;  %v1181_v8 = vld [vmem:[#allocation7 + $0x1e0] sm:$0xff] }
 0x1a0   :  { %2663 = vmatprep.subr.mxu0 %v569_v9  ;;  %884 = vmatpush2.msra.mxu1 %v557_v46  ;;  %v1177_v9 = vld [vmem:[#allocation7 + $0x1c0] sm:$0xff]  ;;  %v639_v46 = vld [vmem:[#allocation6 + $0x688] sm:$0xff] }
 0x1a1   :  { %2664 = vmatpush3.msra.mxu0 %v489_v10  ;;  %885 = vmatprep.subr.mxu1 %v553_v11  ;;  %v1176_v10 = vld [vmem:[#allocation7 + $0x1b8] sm:$0xff] }
 0x1a2   :  { %2665 = vmatprep.subr.mxu0 %v564_v12  ;;  %886 = vmatpush2.msra.mxu1 %v552_v13  ;;  %v1172_v11 = vld [vmem:[#allocation7 + $0x198] sm:$0xff]  ;;  %v634_v12 = vld [vmem:[#allocation6 + $0x660] sm:$0xff]  ;;  %v1171_v13 = vld [vmem:[#allocation7 + $0x190] sm:$0xff] }
 0x1a3   :  { %2666 = vmatpush3.msra.mxu0 %v484_v14  ;;  %887 = vmatprep.subr.mxu1 %v548_v15  ;;  %v1167_v14 = vld [vmem:[#allocation7 + $0x170] sm:$0xff]  ;;  %v629_v15 = vld [vmem:[#allocation6 + $0x638] sm:$0xff] }
 0x1a4   :  { %2667 = vmatprep.subr.mxu0 %v559_v16  ;;  %888 = vmatpush2.msra.mxu1 %v547_v17  ;;  %v1166_v16 = vld [vmem:[#allocation7 + $0x168] sm:$0xff] }
 0x1a5   :  { %2668 = vmatpush3.msra.mxu0 %v479_v18  ;;  %889 = vmatprep.subr.mxu1 %v543_v19  ;;  %v1162_v17 = vld [vmem:[#allocation7 + $0x148] sm:$0xff]  ;;  %v624_v18 = vld [vmem:[#allocation6 + $0x610] sm:$0xff]  ;;  %v1161_v19 = vld [vmem:[#allocation7 + $0x140] sm:$0xff] }
 0x1a6   :  { %2669 = vmatprep.subr.mxu0 %v554_v20  ;;  %890 = vmatpush2.msra.mxu1 %v542_v21  ;;  %v1157_v20 = vld [vmem:[#allocation7 + $0x120] sm:$0xff]  ;;  %v619_v21 = vld [vmem:[#allocation6 + $0x5e8] sm:$0xff] }
 0x1a7   :  { %2670 = vmatpush3.msra.mxu0 %v474_v25  ;;  %891 = vmatprep.subr.mxu1 %v538_v28  ;;  %v1156_v25 = vld [vmem:[#allocation7 + $0x118] sm:$0xff] }
 0x1a8   :  { %2671 = vmatprep.subr.mxu0 %v549_v29  ;;  %892 = vmatpush2.msra.mxu1 %v537_v30  ;;  %v1152_v28 = vld [vmem:[#allocation7 + $0xf8] sm:$0xff]  ;;  %v614_v29 = vld [vmem:[#allocation6 + $0x5c0] sm:$0xff]  ;;  %v1151_v30 = vld [vmem:[#allocation7 + $0xf0] sm:$0xff] }
 0x1a9   :  { %2672 = vmatpush3.msra.mxu0 %v469_v31  ;;  %893 = vmatprep.subr.mxu1 %v533_v32  ;;  %v1147_v31 = vld [vmem:[#allocation7 + $0xd0] sm:$0xff]  ;;  %v609_v32 = vld [vmem:[#allocation6 + $0x598] sm:$0xff] }
 0x1aa   :  { %2673 = vmatprep.subr.mxu0 %v544_v33  ;;  %894 = vmatpush2.msra.mxu1 %v532_v34  ;;  %v1146_v33 = vld [vmem:[#allocation7 + $0xc8] sm:$0xff] }
 0x1ab   :  { %2674 = vmatpush3.msra.mxu0 %v464_v35  ;;  %895 = vmatprep.subr.mxu1 %v528_v36  ;;  %v1142_v34 = vld [vmem:[#allocation7 + $0xa8] sm:$0xff]  ;;  %v604_v35 = vld [vmem:[#allocation6 + $0x570] sm:$0xff]  ;;  %v1141_v36 = vld [vmem:[#allocation7 + $0xa0] sm:$0xff] }
 0x1ac   :  { %2675 = vmatprep.subr.mxu0 %v539_v37  ;;  %896 = vmatpush2.msra.mxu1 %v527_v38  ;;  %v1137_v37 = vld [vmem:[#allocation7 + $0x80] sm:$0xff]  ;;  %v599_v38 = vld [vmem:[#allocation6 + $0x548] sm:$0xff] }
 0x1ad   :  { %2676 = vmatpush3.msra.mxu0 %v459_v39  ;;  %897 = vmatprep.subr.mxu1 %v523_v41  ;;  %v1136_v39 = vld [vmem:[#allocation7 + $0x78] sm:$0xff] }
 0x1ae   :  { %2677 = vmatprep.subr.mxu0 %v534_v42  ;;  %898 = vmatpush2.msra.mxu1 %v522_v43  ;;  %v1132_v41 = vld [vmem:[#allocation7 + $0x58] sm:$0xff]  ;;  %v594_v42 = vld [vmem:[#allocation6 + $0x520] sm:$0xff]  ;;  %v1131_v43 = vld [vmem:[#allocation7 + $0x50] sm:$0xff] }
 0x1af   :  { %2678 = vmatpush3.msra.mxu0 %v454_v44  ;;  %899 = vmatprep.subr.mxu1 %v518_v45  ;;  %v1127_v44 = vld [vmem:[#allocation7 + $0x30] sm:$0xff] }
 0x1b0   :  { %2679 = vmatprep.subr.mxu0 %v529_v47  ;;  %900 = vmatpush2.msra.mxu1 %v517_v48  ;;  %v1199_v45 = vld [vmem:[#allocation7 + $0x270] sm:$0xff]  ;;  %v1126_v47 = vld [vmem:[#allocation7 + $0x28] sm:$0xff] }
 0x1b1   :  { %2680 = vmatpush3.msra.mxu0 %v449_v49  ;;  %901 = vmatprep.subr.mxu1 %v513_v51  ;;  %v1198_v48 = vld [vmem:[#allocation7 + $0x268] sm:$0xff] }
 0x1b2   :  { %2681 = vmatprep.subr.mxu0 %v524_v52  ;;  %902 = vmatpush2.msra.mxu1 %v512_v53  ;;  %v1122_v49 = vld [vmem:[#allocation7 + $0x8] sm:$0xff]  ;;  %v1121_v52 = vld [vmem:[#allocation7] sm:$0xff] }
 0x1b3   :  { %2682 = vmatpush3.msra.mxu0 %v444_v54  ;;  %904 = vmatmul.mubr.f32.vlgmr.msra.gmra.mxu1 %v3769_v50  ;;  %v1194_v51 = vld [vmem:[#allocation7 + $0x248] sm:$0xff]  ;;  %v1193_v53 = vld [vmem:[#allocation7 + $0x240] sm:$0xff] }
 0x1b4   :  { %2683 = vmatprep.subr.mxu0 %v519_v55  ;;  %3001 = vmatprep.subr.mxu1 %v3538_v0  ;;  %v1189_v54 = vld [vmem:[#allocation7 + $0x220] sm:$0xff]  ;;  %v1188_v55 = vld [vmem:[#allocation7 + $0x218] sm:$0xff] }
 0x1b5   :  { %2684 = vmatpush3.msra.mxu0 %v439_v56  ;;  %3002 = vmatpush3.msra.mxu1 %v669_v57  ;;  %v1200_v56 = vld [vmem:[#allocation7 + $0x278] sm:$0xff] }
 0x1b6   :  { %2685 = vmatprep.subr.mxu0 %v514_v58  ;;  %3003 = vmatprep.subr.mxu1 %v3538_v0  ;;  %v1184_v57 = vld [vmem:[#allocation7 + $0x1f8] sm:$0xff]  ;;  %v1183_v58 = vld [vmem:[#allocation7 + $0x1f0] sm:$0xff] }
 0x1b7   :  { %2686 = vmatpush3.msra.mxu0 %v434_v59  ;;  %3004 = vmatpush3.msra.mxu1 %v664_v60  ;;  %v1195_v59 = vld [vmem:[#allocation7 + $0x250] sm:$0xff] }
 0x1b8   :  { %1046 = vmatmul.mubr.f32.vlgmr.msra.gmra.mxu0 %v3769_v50  ;;  %3005 = vmatprep.subr.mxu1 %v3538_v0  ;;  %v644_v50 = vld [vmem:[#allocation6 + $0x6b0] sm:$0xff] }
 0x1b9   :  { %1228 = vmatprep.subr.mxu0 %v1197_v61  ;;  %3006 = vmatpush3.msra.mxu1 %v659_v62  ;;  %v1179_v60 = vld [vmem:[#allocation7 + $0x1d0] sm:$0xff]  ;;  %v1178_v61 = vld [vmem:[#allocation7 + $0x1c8] sm:$0xff] }
 0x1ba   :  { %1229 = vmatpush1.msra.mxu0 %v1196_v63  ;;  %3007 = vmatprep.subr.mxu1 %v3538_v0  ;;  %v1190_v62 = vld [vmem:[#allocation7 + $0x228] sm:$0xff] }
 0x1bb   :  { %1230 = vmatprep.subr.mxu0 %v1192_v1  ;;  %3008 = vmatpush3.msra.mxu1 %v654_v2  ;;  %v1174_v63 = vld [vmem:[#allocation7 + $0x1a8] sm:$0xff]  ;;  %v1173_v1 = vld [vmem:[#allocation7 + $0x1a0] sm:$0xff] }
 0x1bc   :  { %1231 = vmatpush1.msra.mxu0 %v1191_v3  ;;  %3009 = vmatprep.subr.mxu1 %v3538_v0  ;;  %v1185_v2 = vld [vmem:[#allocation7 + $0x200] sm:$0xff] }
 0x1bd   :  { %1232 = vmatprep.subr.mxu0 %v1187_v4  ;;  %3010 = vmatpush3.msra.mxu1 %v649_v5  ;;  %v1169_v3 = vld [vmem:[#allocation7 + $0x180] sm:$0xff]  ;;  %v1168_v4 = vld [vmem:[#allocation7 + $0x178] sm:$0xff] }
 0x1be   :  { %1233 = vmatpush1.msra.mxu0 %v1186_v6  ;;  %3011 = vmatprep.subr.mxu1 %v3538_v0  ;;  %v1180_v5 = vld [vmem:[#allocation7 + $0x1d8] sm:$0xff] }
 0x1bf   :  { %1234 = vmatprep.subr.mxu0 %v1182_v7  ;;  %3012 = vmatpush3.msra.mxu1 %v644_v50  ;;  %v1164_v6 = vld [vmem:[#allocation7 + $0x158] sm:$0xff]  ;;  %v1163_v7 = vld [vmem:[#allocation7 + $0x150] sm:$0xff] }
 0x1c0   :  { %1235 = vmatpush1.msra.mxu0 %v1181_v8  ;;  %3013 = vmatprep.subr.mxu1 %v3538_v0  ;;  %v1175_v50 = vld [vmem:[#allocation7 + $0x1b0] sm:$0xff] }
 0x1c1   :  { %1236 = vmatprep.subr.mxu0 %v1177_v9  ;;  %3014 = vmatpush3.msra.mxu1 %v639_v46  ;;  %v1159_v8 = vld [vmem:[#allocation7 + $0x130] sm:$0xff]  ;;  %v1158_v9 = vld [vmem:[#allocation7 + $0x128] sm:$0xff] }
 0x1c2   :  { %1237 = vmatpush1.msra.mxu0 %v1176_v10  ;;  %3015 = vmatprep.subr.mxu1 %v3538_v0  ;;  %v1170_v46 = vld [vmem:[#allocation7 + $0x188] sm:$0xff] }
 0x1c3   :  { %1238 = vmatprep.subr.mxu0 %v1172_v11  ;;  %3016 = vmatpush3.msra.mxu1 %v634_v12  ;;  %v1154_v10 = vld [vmem:[#allocation7 + $0x108] sm:$0xff]  ;;  %v1153_v11 = vld [vmem:[#allocation7 + $0x100] sm:$0xff] }
 0x1c4   :  { %1239 = vmatpush1.msra.mxu0 %v1171_v13  ;;  %3017 = vmatprep.subr.mxu1 %v3538_v0  ;;  %v1165_v12 = vld [vmem:[#allocation7 + $0x160] sm:$0xff] }
 0x1c5   :  { %1240 = vmatprep.subr.mxu0 %v1167_v14  ;;  %3018 = vmatpush3.msra.mxu1 %v629_v15  ;;  %v1149_v13 = vld [vmem:[#allocation7 + $0xe0] sm:$0xff]  ;;  %v1148_v14 = vld [vmem:[#allocation7 + $0xd8] sm:$0xff] }
 0x1c6   :  { %1241 = vmatpush1.msra.mxu0 %v1166_v16  ;;  %3019 = vmatprep.subr.mxu1 %v3538_v0  ;;  %v1160_v15 = vld [vmem:[#allocation7 + $0x138] sm:$0xff] }
 0x1c7   :  { %1242 = vmatprep.subr.mxu0 %v1162_v17  ;;  %3020 = vmatpush3.msra.mxu1 %v624_v18  ;;  %v1144_v16 = vld [vmem:[#allocation7 + $0xb8] sm:$0xff]  ;;  %v1143_v17 = vld [vmem:[#allocation7 + $0xb0] sm:$0xff] }
 0x1c8   :  { %1243 = vmatpush1.msra.mxu0 %v1161_v19  ;;  %3021 = vmatprep.subr.mxu1 %v3538_v0  ;;  %v1155_v18 = vld [vmem:[#allocation7 + $0x110] sm:$0xff] }
 0x1c9   :  { %1244 = vmatprep.subr.mxu0 %v1157_v20  ;;  %3022 = vmatpush3.msra.mxu1 %v619_v21  ;;  %v1139_v19 = vld [vmem:[#allocation7 + $0x90] sm:$0xff]  ;;  %v1138_v20 = vld [vmem:[#allocation7 + $0x88] sm:$0xff] }
 0x1ca   :  { %1245 = vmatpush1.msra.mxu0 %v1156_v25  ;;  %3023 = vmatprep.subr.mxu1 %v3538_v0  ;;  %v1150_v21 = vld [vmem:[#allocation7 + $0xe8] sm:$0xff] }
 0x1cb   :  { %1246 = vmatprep.subr.mxu0 %v1152_v28  ;;  %3024 = vmatpush3.msra.mxu1 %v614_v29  ;;  %v1134_v25 = vld [vmem:[#allocation7 + $0x68] sm:$0xff]  ;;  %v1133_v28 = vld [vmem:[#allocation7 + $0x60] sm:$0xff] }
 0x1cc   :  { %1247 = vmatpush1.msra.mxu0 %v1151_v30  ;;  %3025 = vmatprep.subr.mxu1 %v3538_v0  ;;  %v1145_v29 = vld [vmem:[#allocation7 + $0xc0] sm:$0xff] }
 0x1cd   :  { %1248 = vmatprep.subr.mxu0 %v1147_v31  ;;  %3026 = vmatpush3.msra.mxu1 %v609_v32  ;;  %v1129_v30 = vld [vmem:[#allocation7 + $0x40] sm:$0xff]  ;;  %v1128_v31 = vld [vmem:[#allocation7 + $0x38] sm:$0xff] }
 0x1ce   :  { %1249 = vmatpush1.msra.mxu0 %v1146_v33  ;;  %3027 = vmatprep.subr.mxu1 %v3538_v0  ;;  %v1140_v32 = vld [vmem:[#allocation7 + $0x98] sm:$0xff] }
 0x1cf   :  { %1250 = vmatprep.subr.mxu0 %v1142_v34  ;;  %3028 = vmatpush3.msra.mxu1 %v604_v35  ;;  %v1124_v33 = vld [vmem:[#allocation7 + $0x18] sm:$0xff]  ;;  %v1123_v34 = vld [vmem:[#allocation7 + $0x10] sm:$0xff] }
 0x1d0   :  { %1251 = vmatpush1.msra.mxu0 %v1141_v36  ;;  %3029 = vmatprep.subr.mxu1 %v3538_v0  ;;  %v1135_v35 = vld [vmem:[#allocation7 + $0x70] sm:$0xff]  ;;  %v1130_v36 = vld [vmem:[#allocation7 + $0x48] sm:$0xff] }
 0x1d1   :  { %1252 = vmatprep.subr.mxu0 %v1137_v37  ;;  %3030 = vmatpush3.msra.mxu1 %v599_v38  ;;  %v1125_v37 = vld [vmem:[#allocation7 + $0x20] sm:$0xff] }
 0x1d2   :  { %1253 = vmatpush1.msra.mxu0 %v1136_v39  ;;  %3031 = vmatprep.subr.mxu1 %v3538_v0 }
 0x1d3   :  { %1254 = vmatprep.subr.mxu0 %v1132_v41  ;;  %3032 = vmatpush3.msra.mxu1 %v594_v42 }
 0x1d4   :  { %3033 = vmatprep.mubr.msk.f32.mxu1 %vm3539_vm0, %v3538_v0  ;;  %1255 = vmatpush1.msra.mxu0 %v1131_v43 }
 0x1d5   :  { %3034 = vmatmul.mubr.f32.vlgmr.msra.gmra.mxu1 %v3762_v40  ;;  %1256 = vmatprep.subr.mxu0 %v1127_v44  ;;  %v3800_v40 = vld [vmem:[%s4129_s26] sm:$0xff] }
 0x1d6   :  { %1299 = vmatprep.subr.mxu1 %v1199_v45  ;;  %1257 = vmatpush1.msra.mxu0 %v1126_v47 }
 0x1d7   :  { %1300 = vmatpush1.msra.mxu1 %v1198_v48  ;;  %1258 = vmatprep.subr.mxu0 %v1122_v49 }
 0x1d8   :  { %1301 = vmatprep.subr.mxu1 %v1194_v51  ;;  %1259 = vmatpush1.msra.mxu0 %v1121_v52 }
 0x1d9   :  { %1292 = vmatprep.mubr.f32.mxu0 %v3538_v0  ;;  %1302 = vmatpush1.msra.mxu1 %v1193_v53  ;;  %v670_v53 = vld [vmem:[%s4130_s17] sm:$0x1f] }
 0x1da   :  { %1293 = vmatmul.mubr.f32.vlgmr.msra.gmra.mxu0 %v3800_v40  ;;  %1303 = vmatprep.subr.mxu1 %v1189_v54 }
 0x1db   :  { %3036 = vmatprep.subr.mxu0 %v3538_v0  ;;  %1304 = vmatpush1.msra.mxu1 %v1188_v55  ;;  %v679_v55 = vrot.slane %v670_v53, %v3757_v27 }
 0x1dc   :  { %3037 = vmatpush3.msra.mxu0 %v1200_v56  ;;  %1305 = vmatprep.subr.mxu1 %v1184_v57  ;;  %v1201_v56 = vld [vmem:[%s4131_s3] sm:$0x1f]  ;;  %v3833_v57 = vsub.s32 3, %v3748_v23 }
 0x1dd   :  { %3038 = vmatprep.subr.mxu0 %v3538_v0  ;;  %1306 = vmatpush1.msra.mxu1 %v1183_v58  ;;  %v1210_v58 = vrot.slane %v1201_v56, %v3757_v27 }
 0x1de   :  { %3039 = vmatpush3.msra.mxu0 %v1195_v59  ;;  %1307 = vmatprep.subr.mxu1 %v1179_v60 }
 0x1df   :  { %3040 = vmatprep.subr.mxu0 %v3538_v0  ;;  %1308 = vmatpush1.msra.mxu1 %v1178_v61  ;;  %v683_v61 = vrot.slane %v670_v53, %v3751_v24 }
 0x1e0   :  { %3041 = vmatpush3.msra.mxu0 %v1190_v62  ;;  %1309 = vmatprep.subr.mxu1 %v1174_v63  ;;  %v1206_v62 = vrot.slane %v1201_v56, %v3754_v26 }
 0x1e1   :  { %3042 = vmatprep.subr.mxu0 %v3538_v0  ;;  %1310 = vmatpush1.msra.mxu1 %v1173_v1  ;;  %v687_v1 = vrot.slane %v670_v53, %v3833_v57 }
 0x1e2   :  { %3043 = vmatpush3.msra.mxu0 %v1185_v2  ;;  %1311 = vmatprep.subr.mxu1 %v1169_v3  ;;  %v3840_v3 = vsub.s32 4, %v3748_v23 }
 0x1e3   :  { %3044 = vmatprep.subr.mxu0 %v3538_v0  ;;  %1312 = vmatpush1.msra.mxu1 %v1168_v4 }
 0x1e4   :  { %3045 = vmatpush3.msra.mxu0 %v1180_v5  ;;  %1313 = vmatprep.subr.mxu1 %v1164_v6  ;;  %v1222_v23 = vrot.slane %v1201_v56, %v3840_v3 }
 0x1e5   :  { %3046 = vmatprep.subr.mxu0 %v3538_v0  ;;  %1314 = vmatpush1.msra.mxu1 %v1163_v7  ;;  %v1214_v7 = vrot.slane %v1201_v56, %v3751_v24 }
 0x1e6   :  { %3047 = vmatpush3.msra.mxu0 %v1175_v50  ;;  %1315 = vmatprep.subr.mxu1 %v1159_v8 }
 0x1e7   :  { %3048 = vmatprep.subr.mxu0 %v3538_v0  ;;  %1316 = vmatpush1.msra.mxu1 %v1158_v9 }
 0x1e8   :  { %3049 = vmatpush3.msra.mxu0 %v1170_v46  ;;  %1317 = vmatprep.subr.mxu1 %v1154_v10  ;;  %v1218_v46 = vrot.slane %v1201_v56, %v3833_v57 }
 0x1e9   :  { %3050 = vmatprep.subr.mxu0 %v3538_v0  ;;  %1318 = vmatpush1.msra.mxu1 %v1153_v11  ;;  %v691_v11 = vrot.slane %v670_v53, %v3840_v3 }
 0x1ea   :  { %3051 = vmatpush3.msra.mxu0 %v1165_v12  ;;  %1319 = vmatprep.subr.mxu1 %v1149_v13 }
 0x1eb   :  { %3052 = vmatprep.subr.mxu0 %v3538_v0  ;;  %1320 = vmatpush1.msra.mxu1 %v1148_v14 }
 0x1ec   :  { %3053 = vmatpush3.msra.mxu0 %v1160_v15  ;;  %1321 = vmatprep.subr.mxu1 %v1144_v16 }
 0x1ed   :  { %3054 = vmatprep.subr.mxu0 %v3538_v0  ;;  %1322 = vmatpush1.msra.mxu1 %v1143_v17 }
 0x1ee   :  { %3055 = vmatpush3.msra.mxu0 %v1155_v18  ;;  %1323 = vmatprep.subr.mxu1 %v1139_v19 }
 0x1ef   :  { %3056 = vmatprep.subr.mxu0 %v3538_v0  ;;  %1324 = vmatpush1.msra.mxu1 %v1138_v20 }
 0x1f0   :  { %3057 = vmatpush3.msra.mxu0 %v1150_v21  ;;  %1325 = vmatprep.subr.mxu1 %v1134_v25 }
 0x1f1   :  { %3058 = vmatprep.subr.mxu0 %v3538_v0  ;;  %1326 = vmatpush1.msra.mxu1 %v1133_v28 }
 0x1f2   :  { %3059 = vmatpush3.msra.mxu0 %v1145_v29  ;;  %1327 = vmatprep.subr.mxu1 %v1129_v30 }
 0x1f3   :  { %3060 = vmatprep.subr.mxu0 %v3538_v0  ;;  %1328 = vmatpush1.msra.mxu1 %v1128_v31 }
 0x1f4   :  { %3061 = vmatpush3.msra.mxu0 %v1140_v32  ;;  %1329 = vmatprep.subr.mxu1 %v1124_v33 }
 0x1f5   :  { %3062 = vmatprep.subr.mxu0 %v3538_v0  ;;  %1330 = vmatpush1.msra.mxu1 %v1123_v34 }
 0x1f6   :  { %1363 = vmatprep.mubr.f32.mxu1 %v3538_v0  ;;  %3063 = vmatpush3.msra.mxu0 %v1135_v35 }
 0x1f7   :  { %1364 = vmatmul.mubr.f32.vlgmr.msra.gmra.mxu1 %v3800_v40  ;;  %3064 = vmatprep.subr.mxu0 %v3538_v0 }
 0x1f8   :  { %3068 = vmatprep.mubr.msk.f32.mxu0 %vm3539_vm0, %v3538_v0  ;;  %3065 = vmatpush3.msra.mxu0 %v1130_v36  ;;  %v1597_v36 = vld [vmem:[#allocation9 + $0xf8] sm:$0xff] }
 0x1f9   :  { %3066 = vmatprep.subr.mxu0 %v3538_v0  ;;  %2724 = vmatprep.subr.mxu1 %v1597_v36  ;;  %v1620_v36 = vld [vmem:[#allocation9 + $0x1b0] sm:$0xff] }
 0x1fa   :  { %3067 = vmatpush3.msra.mxu0 %v1125_v37  ;;  %v1581_v37 = vld [vmem:[#allocation9 + $0x78] sm:$0xff] }
 0x1fb   :  { %3069 = vmatmul.mubr.f32.vlgmr.msra.gmra.mxu0 %v3800_v40  ;;  %v675_v40 = vrot.slane %v670_v53, %v3754_v26  ;;  %2725 = vmatpush3.msra.mxu1 %v1581_v37  ;;  %v1578_v53 = vld [vmem:[#allocation9 + $0x60] sm:$0xff]  ;;  %v1587_v37 = vld [vmem:[#allocation9 + $0xa8] sm:$0xff] }
 0x232   :  { %v834_v38 = vpop.f32.mrf.mxu1 }
 0x234   :  { %v836_v39 = vpop.f32.mrf.mxu1 }
 0x236   :  { %v763_v45 = vpop.f32.mrf.mxu0 }
 0x237   :  { %v764_v63 = vadd.f32 %v763_v45, %v675_v40  ;;  %v1595_v45 = vld [vmem:[#allocation9 + $0xe8] sm:$0xff] }
 0x238   :  { %v765_v47 = vpop.f32.mrf.mxu0 }
 0x239   :  { %v766_v60 = vadd.f32 %v765_v47, %v679_v55  ;;  %v835_v50 = vadd.f32 %v834_v38, %v764_v63  ;;  %v1629_v38 = vld [vmem:[#allocation9 + $0x1f8] sm:$0xff]  ;;  %v1612_v47 = vld [vmem:[#allocation9 + $0x170] sm:$0xff] }
 0x23a   :  { %2759 = vmatprep.subr.mxu0 %v1629_v38  ;;  %v1604_v38 = vld [vmem:[#allocation9 + $0x130] sm:$0xff] }
 0x23b   :  { %v837_v4 = vadd.f32 %v836_v39, %v766_v60  ;;  %v1596_v39 = vld [vmem:[#allocation9 + $0xf0] sm:$0xff] }
 0x23c   :  { %2726 = vmatprep.subr.mxu1 %v1596_v39  ;;  %v1571_v39 = vld [vmem:[#allocation9 + $0x28] sm:$0xff] }
 0x257   :  { %v976_v48 = vpop.f32.mrf.mxu0 }
 0x259   :  { %v978_v49 = vpop.f32.mrf.mxu0 }
 0x273   :  { %v905_v41 = vpop.f32.mrf.mxu1 }
 0x274   :  { %v906_v5 = vadd.f32 %v905_v41, %v683_v61  ;;  %v1613_v41 = vld [vmem:[#allocation9 + $0x178] sm:$0xff] }
 0x275   :  { %v907_v42 = vpop.f32.mrf.mxu1  ;;  %2760 = vmatpush3.msra.mxu0 %v1613_v41  ;;  %v1619_v41 = vld [vmem:[#allocation9 + $0x1a8] sm:$0xff] }
 0x276   :  { %v908_v8 = vadd.f32 %v907_v42, %v687_v1  ;;  %v977_v13 = vadd.f32 %v976_v48, %v906_v5  ;;  %v1580_v42 = vld [vmem:[#allocation9 + $0x70] sm:$0xff]  ;;  %v1627_v48 = vld [vmem:[#allocation9 + $0x1e8] sm:$0xff] }
 0x277   :  { %2727 = vmatpush3.msra.mxu1 %v1580_v42  ;;  %v1586_v42 = vld [vmem:[#allocation9 + $0xa0] sm:$0xff] }
 0x278   :  { %v2687_v51 = vpop.f32.mrf.mxu0  ;;  %v979_v17 = vadd.f32 %v978_v49, %v908_v8  ;;  %v1594_v49 = vld [vmem:[#allocation9 + $0xe0] sm:$0xff]  ;;  %2728 = vmatprep.subr.mxu1 %v1595_v45 }
 0x279   :  { %v1570_v45 = vld [vmem:[#allocation9 + $0x20] sm:$0xff] }
 0x27a   :  { %v2688_v52 = vpop.f32.mrf.mxu0 }
 0x27b   :  { %v2689_v10 = vadd.f32 %v2688_v52, %v2687_v51  ;;  %v1611_v51 = vld [vmem:[#allocation9 + $0x168] sm:$0xff]  ;;  %v1626_v52 = vld [vmem:[#allocation9 + $0x1e0] sm:$0xff] }
 0x27d   :  { %v1048_v21 = vadd.f32 %v2689_v10, %v691_v11  ;;  %v1610_v10 = vld [vmem:[#allocation9 + $0x160] sm:$0xff]  ;;  %v1577_v11 = vld [vmem:[#allocation9 + $0x58] sm:$0xff] }
 0x295   :  { %v1117_v43 = vpop.f32.mrf.mxu1 }
 0x296   :  { %v1118_v30 = vadd.f32 %v1117_v43, %v1048_v21  ;;  %v1579_v43 = vld [vmem:[#allocation9 + $0x68] sm:$0xff] }
 0x297   :  { %v3035_v44 = vpop.f32.mrf.mxu1  ;;  %2729 = vmatpush3.msra.mxu1 %v1579_v43  ;;  %v1607_v21 = vld [vmem:[#allocation9 + $0x148] sm:$0xff]  ;;  %v1585_v43 = vld [vmem:[#allocation9 + $0x98] sm:$0xff] }
 0x298   :  { %v1628_v44 = vld [vmem:[#allocation9 + $0x1f0] sm:$0xff]  ;;  %2730 = vmatprep.subr.mxu1 %v1594_v49  ;;  %v1569_v49 = vld [vmem:[#allocation9 + $0x18] sm:$0xff] }
 0x299   :  { %2761 = vmatprep.subr.mxu0 %v1628_v44  ;;  %2731 = vmatpush3.msra.mxu1 %v1578_v53  ;;  %v1603_v44 = vld [vmem:[#allocation9 + $0x128] sm:$0xff]  ;;  %v1601_v53 = vld [vmem:[#allocation9 + $0x118] sm:$0xff] }
 0x29a   :  { %v1294_v54 = vpop.f32.mrf.mxu0  ;;  %2762 = vmatpush3.msra.mxu0 %v1612_v47  ;;  %v1618_v47 = vld [vmem:[#allocation9 + $0x1a0] sm:$0xff] }
 0x29b   :  { %v1295_v6 = vadd.f32 %v1294_v54, %v1206_v62  ;;  %2763 = vmatprep.subr.mxu0 %v1627_v48  ;;  %v3847_v54 = vand.u32 127, %v265_v22  ;;  %v1602_v48 = vld [vmem:[#allocation9 + $0x120] sm:$0xff] }
 0x29c   :  { %v1296_v59 = vpop.f32.mrf.mxu0  ;;  %2764 = vmatpush3.msra.mxu0 %v1611_v51  ;;  %v1617_v51 = vld [vmem:[#allocation9 + $0x198] sm:$0xff] }
 0x29d   :  { %v1297_v2 = vadd.f32 %v1296_v59, %v1210_v58  ;;  %v1440_v14 = vadd.f32 %v1295_v6, %v835_v50  ;;  %2765 = vmatprep.subr.mxu0 %v1626_v52  ;;  %v1450_v55 = vadd.s32 512, %v3847_v54  ;;  %v1584_v52 = vld [vmem:[#allocation9 + $0x90] sm:$0xff]  ;;  %vm2257_vm6 = vcmp.lt.s32.totalorder %v3847_v54, 32 }
 0x29e   :  { %2766 = vmatpush3.msra.mxu0 %v1610_v10  ;;  %v3881_v10 = vld [vmem:[%s4133_s29] sm:$0x1f]  ;;  %vm2571_vm8 = vcmp.lt.s32.totalorder %v3847_v54, 2 }
 0x29f   :  { %v1441_v9 = vadd.f32 %v1297_v2, %v837_v4  ;;  %vm1455_vm4 = vcmp.lt.s32.totalorder %v1450_v55, 564  ;;  %v1568_v55 = vld [vmem:[#allocation9 + $0x10] sm:$0xff] }
 0x2a0   :  { %v2625_v61 = vsel %vm1455_vm4, 1.0, %v3538_v0 }
 0x2a1   :  { %v1466_v18 = vadd.f32 %v1441_v9, %v1440_v14 }
 0x2b7   :  { %v1365_v12 = vpop.f32.mrf.mxu1 }
 0x2b8   :  { %v1366_v15 = vadd.f32 %v1365_v12, %v1214_v7  ;;  %v1625_v12 = vld [vmem:[#allocation9 + $0x1d8] sm:$0xff] }
 0x2b9   :  { %v1367_v16 = vpop.f32.mrf.mxu1  ;;  %2767 = vmatprep.subr.mxu0 %v1625_v12 }
 0x2ba   :  { %v1442_v19 = vadd.f32 %v1366_v15, %v977_v13  ;;  %v1368_v20 = vadd.f32 %v1367_v16, %v1218_v46  ;;  %v1593_v46 = vld [vmem:[#allocation9 + $0xd8] sm:$0xff]  ;;  %v1592_v13 = vld [vmem:[#allocation9 + $0xd0] sm:$0xff] }
 0x2bb   :  { %v1436_v28 = vpop.f32.mrf.mxu0  ;;  %2732 = vmatprep.subr.mxu1 %v1593_v46  ;;  %v1576_v15 = vld [vmem:[#allocation9 + $0x50] sm:$0xff]  ;;  %v3876_v46 = vld [vmem:[%s4132_s5] sm:$0x1f] }
 0x2bc   :  { %v1443_v25 = vadd.f32 %v1368_v20, %v979_v17  ;;  %v1467_v29 = vadd.f32 %v1466_v18, %v1442_v19  ;;  %v1437_v31 = vadd.f32 %v1436_v28, %v1222_v23  ;;  %2733 = vmatpush3.msra.mxu1 %v1577_v11  ;;  %v1624_v16 = vld [vmem:[#allocation9 + $0x1d0] sm:$0xff]  ;;  %v1591_v23 = vld [vmem:[#allocation9 + $0xc8] sm:$0xff]  ;;  %v1590_v20 = vld [vmem:[#allocation9 + $0xc0] sm:$0xff]  ;;  %v1511_v11 = vrot.slane %v3876_v46, %v3757_v27 }
 0x2bd   :  { %v3070_v32 = vpop.f32.mrf.mxu0  ;;  %2734 = vmatprep.subr.mxu1 %v1592_v13  ;;  %v1608_v17 = vld [vmem:[#allocation9 + $0x150] sm:$0xff]  ;;  %v1575_v18 = vld [vmem:[#allocation9 + $0x48] sm:$0xff]  ;;  %v1622_v28 = vld [vmem:[#allocation9 + $0x1c0] sm:$0xff]  ;;  %v1519_v12 = vrot.slane %v3876_v46, %v3833_v57  ;;  %v1507_v13 = vrot.slane %v3876_v46, %v3754_v26 }
 0x2be   :  { %v1468_v33 = vadd.f32 %v1467_v29, %v1443_v25  ;;  %v1444_v34 = vadd.f32 %v1437_v31, %v1118_v30  ;;  %2735 = vmatpush3.msra.mxu1 %v1576_v15  ;;  %v1589_v29 = vld [vmem:[#allocation9 + $0xb8] sm:$0xff]  ;;  %v1606_v30 = vld [vmem:[#allocation9 + $0x140] sm:$0xff] }
 0x2bf   :  { %2736 = vmatprep.subr.mxu1 %v1591_v23  ;;  %v1573_v31 = vld [vmem:[#allocation9 + $0x38] sm:$0xff]  ;;  %v1551_v23 = vrot.slane %v3881_v10, %v3833_v57 }
 0x2c0   :  { %v1469_v35 = vadd.f32 %v1468_v33, %v1444_v34  ;;  %2737 = vmatpush3.msra.mxu1 %v1575_v18  ;;  %v1621_v32 = vld [vmem:[#allocation9 + $0x1b8] sm:$0xff]  ;;  %v1588_v33 = vld [vmem:[#allocation9 + $0xb0] sm:$0xff]  ;;  %v1547_v18 = vrot.slane %v3881_v10, %v3751_v24 }
 0x2c1   :  { %2738 = vmatprep.subr.mxu1 %v1590_v20 }
 0x2c2   :  { %1470 = vadd.xlane.f32.xlu0 %v1469_v35  ;;  %v1572_v35 = vld [vmem:[#allocation9 + $0x30] sm:$0xff] }
 0x34b   :  { %v1471_v56 = vpop.xlane.xlu0 %1470 }
 0x34c   :  { %v1472_v40 = vmul.f32 0.0017730496, %v1471_v56  ;;  %v1616_v56 = vld [vmem:[#allocation9 + $0x190] sm:$0xff] }
 0x34e   :  { %v3850_v58 = vsub.f32 %v1440_v14, %v1472_v40  ;;  %v3852_v59 = vsub.f32 %v1441_v9, %v1472_v40  ;;  %v3854_v60 = vsub.f32 %v1442_v19, %v1472_v40  ;;  %v1477_v62 = vsub.f32 %v1444_v34, %v1472_v40  ;;  %v1609_v14 = vld [vmem:[#allocation9 + $0x158] sm:$0xff]  ;;  %v1623_v19 = vld [vmem:[#allocation9 + $0x1c8] sm:$0xff] }
 0x34f   :  { %v3857_v63 = vsub.f32 %v1443_v25, %v1472_v40  ;;  %2768 = vmatpush3.msra.mxu0 %v1609_v14  ;;  %v1574_v25 = vld [vmem:[#allocation9 + $0x40] sm:$0xff]  ;;  %v1605_v34 = vld [vmem:[#allocation9 + $0x138] sm:$0xff]  ;;  %v1583_v40 = vld [vmem:[#allocation9 + $0x88] sm:$0xff]  ;;  %v1515_v14 = vrot.slane %v3876_v46, %v3751_v24 }
 0x350   :  { %v1483_v22 = vmul.f32 %v3850_v58, %v3850_v58  ;;  %v1484_v1 = vmul.f32 %v3852_v59, %v3852_v59  ;;  %v3863_v2 = vmul.f32 %v2625_v61, %v1477_v62  ;;  %v1485_v4 = vmul.f32 %v3854_v60, %v3854_v60  ;;  %2769 = vmatprep.subr.mxu0 %v1624_v16  ;;  %v1600_v61 = vld [vmem:[#allocation9 + $0x110] sm:$0xff]  ;;  %v1567_v62 = vld [vmem:[#allocation9 + $0x8] sm:$0xff]  ;;  %v1645_v24 = vld [vmem:[#allocation9 + $0x278] sm:$0xff] }
 0x351   :  { %v1486_v6 = vmul.f32 %v3857_v63, %v3857_v63  ;;  %2770 = vmatpush3.msra.mxu0 %v1608_v17  ;;  %2739 = vmatpush3.msra.mxu1 %v1574_v25  ;;  %v1543_v16 = vrot.slane %v3881_v10, %v3757_v27  ;;  %v1539_v17 = vrot.slane %v3881_v10, %v3754_v26 }
 0x352   :  { %v1488_v5 = vadd.f32 %v1484_v1, %v1483_v22  ;;  %v1487_v50 = vmul.f32 %v3863_v2, %v3863_v2  ;;  %2771 = vmatprep.subr.mxu0 %v1623_v19  ;;  %2740 = vmatprep.subr.mxu1 %v1589_v29  ;;  %v1615_v22 = vld [vmem:[#allocation9 + $0x188] sm:$0xff]  ;;  %v1582_v1 = vld [vmem:[#allocation9 + $0x80] sm:$0xff] }
 0x353   :  { %2772 = vmatpush3.msra.mxu0 %v1607_v21  ;;  %2741 = vmatpush3.msra.mxu1 %v1573_v31 }
 0x354   :  { %v1489_v7 = vadd.f32 %v1488_v5, %v1485_v4  ;;  %2773 = vmatprep.subr.mxu0 %v1622_v28  ;;  %2742 = vmatprep.subr.mxu1 %v1588_v33  ;;  %v1599_v4 = vld [vmem:[#allocation9 + $0x108] sm:$0xff]  ;;  %v1566_v5 = vld [vmem:[#allocation9] sm:$0xff]  ;;  %v1640_v33 = vld [vmem:[#allocation9 + $0x250] sm:$0xff] }
 0x355   :  { %2774 = vmatpush3.msra.mxu0 %v1606_v30  ;;  %2743 = vmatpush3.msra.mxu1 %v1572_v35  ;;  %v1638_v35 = vld [vmem:[#allocation9 + $0x240] sm:$0xff] }
 0x356   :  { %v1490_v8 = vadd.f32 %v1489_v7, %v1486_v6  ;;  %2775 = vmatprep.subr.mxu0 %v1621_v32  ;;  %2744 = vmatprep.subr.mxu1 %v1587_v37  ;;  %v1614_v6 = vld [vmem:[#allocation9 + $0x180] sm:$0xff]  ;;  %v1636_v37 = vld [vmem:[#allocation9 + $0x230] sm:$0xff] }
 0x357   :  { %2776 = vmatpush3.msra.mxu0 %v1605_v34  ;;  %2745 = vmatpush3.msra.mxu1 %v1571_v39  ;;  %v1598_v7 = vld [vmem:[#allocation9 + $0x100] sm:$0xff]  ;;  %v1639_v34 = vld [vmem:[#allocation9 + $0x248] sm:$0xff] }
 0x358   :  { %v1491_v9 = vadd.f32 %v1490_v8, %v1487_v50  ;;  %2777 = vmatprep.subr.mxu0 %v1620_v36  ;;  %2746 = vmatprep.subr.mxu1 %v1586_v42  ;;  %v1637_v36 = vld [vmem:[#allocation9 + $0x238] sm:$0xff]  ;;  %v1634_v39 = vld [vmem:[#allocation9 + $0x220] sm:$0xff] }
 0x359   :  { %2778 = vmatpush3.msra.mxu0 %v1604_v38  ;;  %2747 = vmatpush3.msra.mxu1 %v1570_v45  ;;  %v1635_v38 = vld [vmem:[#allocation9 + $0x228] sm:$0xff]  ;;  %v1632_v45 = vld [vmem:[#allocation9 + $0x210] sm:$0xff] }
 0x35a   :  { %1492 = vadd.xlane.f32.xlu0 %v1491_v9  ;;  %2779 = vmatprep.subr.mxu0 %v1619_v41  ;;  %v1633_v41 = vld [vmem:[#allocation9 + $0x218] sm:$0xff] }
 0x35b   :  { %2780 = vmatpush3.msra.mxu0 %v1603_v44  ;;  %2748 = vmatprep.subr.mxu1 %v1585_v43  ;;  %v1523_v44 = vrot.slane %v3876_v46, %v3840_v3  ;;  %v1981_v46 = vld [vmem:[#allocation12 + $0xb0] sm:$0xff] }
 0x35c   :  { %2781 = vmatprep.subr.mxu0 %v1618_v47  ;;  %2749 = vmatpush3.msra.mxu1 %v1569_v49  ;;  %v1631_v47 = vld [vmem:[#allocation9 + $0x208] sm:$0xff]  ;;  %v1630_v49 = vld [vmem:[#allocation9 + $0x200] sm:$0xff] }
 0x35d   :  { %2782 = vmatpush3.msra.mxu0 %v1602_v48  ;;  %2750 = vmatprep.subr.mxu1 %v1584_v52  ;;  %v1555_v48 = vrot.slane %v3881_v10, %v3840_v3  ;;  %v1974_v52 = vld [vmem:[#allocation12 + $0x78] sm:$0xff]  ;;  %v1988_v3 = vld [vmem:[#allocation12 + $0xe8] sm:$0xff]  ;;  %v1965_v10 = vld [vmem:[#allocation12 + $0x30] sm:$0xff] }
 0x35e   :  { %2783 = vmatprep.subr.mxu0 %v1617_v51  ;;  %2751 = vmatpush3.msra.mxu1 %v1568_v55  ;;  %v1973_v55 = vld [vmem:[#allocation12 + $0x70] sm:$0xff] }
 0x35f   :  { %2784 = vmatpush3.msra.mxu0 %v1601_v53  ;;  %2752 = vmatprep.subr.mxu1 %v1583_v40  ;;  %v1989_v53 = vld [vmem:[#allocation12 + $0xf0] sm:$0xff]  ;;  %v1987_v40 = vld [vmem:[#allocation12 + $0xe0] sm:$0xff] }
 0x360   :  { %2785 = vmatprep.subr.mxu0 %v1616_v56  ;;  %2753 = vmatpush3.msra.mxu1 %v1567_v62  ;;  %v1972_v56 = vld [vmem:[#allocation12 + $0x68] sm:$0xff]  ;;  %v1986_v62 = vld [vmem:[#allocation12 + $0xd8] sm:$0xff] }
 0x361   :  { %2786 = vmatpush3.msra.mxu0 %v1600_v61  ;;  %2754 = vmatprep.subr.mxu1 %v1582_v1  ;;  %v1971_v61 = vld [vmem:[#allocation12 + $0x60] sm:$0xff]  ;;  %v1985_v1 = vld [vmem:[#allocation12 + $0xd0] sm:$0xff] }
 0x362   :  { %2787 = vmatprep.subr.mxu0 %v1615_v22  ;;  %2755 = vmatpush3.msra.mxu1 %v1566_v5  ;;  %v1970_v22 = vld [vmem:[#allocation12 + $0x58] sm:$0xff]  ;;  %v1984_v5 = vld [vmem:[#allocation12 + $0xc8] sm:$0xff] }
 0x363   :  { %2788 = vmatpush3.msra.mxu0 %v1599_v4  ;;  %3071 = vmatprep.subr.mxu1 %v3538_v0  ;;  %v1969_v4 = vld [vmem:[#allocation12 + $0x50] sm:$0xff] }
 0x364   :  { %2789 = vmatprep.subr.mxu0 %v1614_v6  ;;  %v1968_v6 = vld [vmem:[#allocation12 + $0x48] sm:$0xff] }
 0x365   :  { %2790 = vmatpush3.msra.mxu0 %v1598_v7  ;;  %v1983_v7 = vld [vmem:[#allocation12 + $0xc0] sm:$0xff] }
 0x366   :  { %3106 = vmatprep.subr.mxu0 %v3538_v0 }
 0x3e3   :  { %v1493_v50 = vpop.xlane.xlu0 %1492 }
 0x3e4   :  { %v1494_v8 = vmul.f32 0.0017730496, %v1493_v50  ;;  %v1967_v50 = vld [vmem:[#allocation12 + $0x40] sm:$0xff] }
 0x3e6   :  { %v1495_v9 = vadd.f32 1e-05, %v1494_v8  ;;  %v1982_v8 = vld [vmem:[#allocation12 + $0xb8] sm:$0xff] }
 0x3e8   :  { %3299 = vrsqrt.f32 %v1495_v9  ;;  %v1966_v9 = vld [vmem:[#allocation12 + $0x38] sm:$0xff] }
 0x3f5   :  { %v3300_v15 = vpop.eup %3299 }
 0x3f6   :  { %v1498_v19 = vmul.f32 %v3300_v15, %v3852_v59  ;;  %v1500_v20 = vmul.f32 %v3300_v15, %v3857_v63  ;;  %v1497_v21 = vmul.f32 %v3300_v15, %v3850_v58  ;;  %v1499_v25 = vmul.f32 %v3300_v15, %v3854_v60  ;;  %v1644_v58 = vld [vmem:[#allocation9 + $0x270] sm:$0xff]  ;;  %v1643_v59 = vld [vmem:[#allocation9 + $0x268] sm:$0xff]  ;;  %v1642_v60 = vld [vmem:[#allocation9 + $0x260] sm:$0xff] }
 0x3f7   :  { %v1641_v63 = vld [vmem:[#allocation9 + $0x258] sm:$0xff]  ;;  %v1501_v42 = vmul.f32 %v3300_v15, %v3863_v2 }
 0x3f8   :  { %v1530_v28 = vmul.f32 %v1511_v11, %v1498_v19  ;;  %v1532_v29 = vmul.f32 %v1519_v12, %v1500_v20  ;;  %v1529_v27 = vmul.f32 %v1507_v13, %v1497_v21  ;;  %v1531_v30 = vmul.f32 %v1515_v14, %v1499_v25  ;;  %v1990_v2 = vld [vmem:[#allocation12 + $0xf8] sm:$0xff]  ;;  %v1980_v11 = vld [vmem:[#allocation12 + $0xa8] sm:$0xff]  ;;  %v1979_v13 = vld [vmem:[#allocation12 + $0xa0] sm:$0xff] }
 0x3f9   :  { %v1533_v43 = vmul.f32 %v1523_v44, %v1501_v42  ;;  %v1964_v12 = vld [vmem:[#allocation12 + $0x28] sm:$0xff]  ;;  %v1963_v14 = vld [vmem:[#allocation12 + $0x20] sm:$0xff]  ;;  %v1978_v15 = vld [vmem:[#allocation12 + $0x98] sm:$0xff] }
 0x3fa   :  { %v3903_v31 = vadd.f32 %v1543_v16, %v1530_v28  ;;  %v3905_v57 = vadd.f32 %v1551_v23, %v1532_v29  ;;  %v3907_v26 = vadd.f32 %v1539_v17, %v1529_v27  ;;  %v3909_v32 = vadd.f32 %v1547_v18, %v1531_v30  ;;  %v1962_v16 = vld [vmem:[#allocation12 + $0x18] sm:$0xff]  ;;  %v1977_v23 = vld [vmem:[#allocation12 + $0x90] sm:$0xff]  ;;  %v1976_v18 = vld [vmem:[#allocation12 + $0x88] sm:$0xff] }
 0x3fb   :  { %v3939_v51 = vadd.f32 %v1555_v48, %v1533_v43  ;;  %v1961_v17 = vld [vmem:[#allocation12 + $0x10] sm:$0xff]  ;;  %v1960_v19 = vld [vmem:[#allocation12 + $0x8] sm:$0xff]  ;;  %v1975_v20 = vld [vmem:[#allocation12 + $0x80] sm:$0xff] }
 0x3fc   :  { %1717 = vmatprep.mubr.f32.mxu1 %v3903_v31  ;;  %1787 = vmatprep.mubr.f32.mxu0 %v3905_v57  ;;  %v1959_v21 = vld [vmem:[#allocation12] sm:$0xff]  ;;  %v2038_v25 = vld [vmem:[#allocation12 + $0x278] sm:$0xff]  ;;  %v2037_v28 = vld [vmem:[#allocation12 + $0x270] sm:$0xff] }
 0x3fd   :  { %1718 = vmatmul.mubr.f32.vlgmr.msra.gmra.mxu1 %v3907_v26  ;;  %1788 = vmatmul.mubr.f32.vlgmr.msra.gmra.mxu0 %v3909_v32  ;;  %v2036_v29 = vld [vmem:[#allocation12 + $0x268] sm:$0xff]  ;;  %v2035_v27 = vld [vmem:[#allocation12 + $0x260] sm:$0xff]  ;;  %v1881_v30 = vld [vmem:[#allocation10 + $0x78] sm:$0xff] }
 0x3fe   :  { %3072 = vmatpush3.msra.mxu1 %v1645_v24  ;;  %3103 = vmatprep.mubr.msk.f32.mxu1 %vm3539_vm0, %v3538_v0  ;;  %v1879_v24 = vld [vmem:[#allocation10 + $0x68] sm:$0xff]  ;;  %v2027_v42 = vld [vmem:[#allocation12 + $0x220] sm:$0xff]  ;;  %v1872_v44 = vld [vmem:[#allocation10 + $0x30] sm:$0xff] }
 0x3ff   :  { %3073 = vmatprep.subr.mxu1 %v3538_v0  ;;  %3138 = vmatprep.mubr.msk.f32.mxu0 %vm3539_vm0, %v3538_v0  ;;  %v2025_v43 = vld [vmem:[#allocation12 + $0x210] sm:$0xff]  ;;  %v1870_v48 = vld [vmem:[#allocation10 + $0x20] sm:$0xff] }
 0x400   :  { %3074 = vmatpush3.msra.mxu1 %v1644_v58  ;;  %3107 = vmatpush3.msra.mxu0 %v1881_v30  ;;  %v2033_v58 = vld [vmem:[#allocation12 + $0x250] sm:$0xff] }
 0x401   :  { %3075 = vmatprep.subr.mxu1 %v3538_v0  ;;  %3108 = vmatprep.subr.mxu0 %v3538_v0  ;;  %v1997_v30 = vld [vmem:[#allocation12 + $0x130] sm:$0xff] }
 0x402   :  { %3076 = vmatpush3.msra.mxu1 %v1643_v59  ;;  %v1878_v59 = vld [vmem:[#allocation10 + $0x60] sm:$0xff] }
 0x403   :  { %3077 = vmatprep.subr.mxu1 %v3538_v0 }
 0x404   :  { %3078 = vmatpush3.msra.mxu1 %v1642_v60  ;;  %v2032_v60 = vld [vmem:[#allocation12 + $0x248] sm:$0xff] }
 0x405   :  { %3079 = vmatprep.subr.mxu1 %v3538_v0 }
 0x406   :  { %3080 = vmatpush3.msra.mxu1 %v1641_v63  ;;  %v1877_v63 = vld [vmem:[#allocation10 + $0x58] sm:$0xff] }
 0x407   :  { %3081 = vmatprep.subr.mxu1 %v3538_v0 }
 0x408   :  { %3082 = vmatpush3.msra.mxu1 %v1640_v33  ;;  %v2031_v33 = vld [vmem:[#allocation12 + $0x240] sm:$0xff] }
 0x409   :  { %3083 = vmatprep.subr.mxu1 %v3538_v0 }
 0x40a   :  { %3084 = vmatpush3.msra.mxu1 %v1639_v34  ;;  %v1876_v34 = vld [vmem:[#allocation10 + $0x50] sm:$0xff] }
 0x40b   :  { %3085 = vmatprep.subr.mxu1 %v3538_v0 }
 0x40c   :  { %3086 = vmatpush3.msra.mxu1 %v1638_v35  ;;  %v2030_v35 = vld [vmem:[#allocation12 + $0x238] sm:$0xff] }
 0x40d   :  { %3087 = vmatprep.subr.mxu1 %v3538_v0 }
 0x40e   :  { %3088 = vmatpush3.msra.mxu1 %v1637_v36  ;;  %v1875_v36 = vld [vmem:[#allocation10 + $0x48] sm:$0xff] }
 0x40f   :  { %3089 = vmatprep.subr.mxu1 %v3538_v0 }
 0x410   :  { %3090 = vmatpush3.msra.mxu1 %v1636_v37  ;;  %v2029_v37 = vld [vmem:[#allocation12 + $0x230] sm:$0xff] }
 0x411   :  { %3091 = vmatprep.subr.mxu1 %v3538_v0 }
 0x412   :  { %3092 = vmatpush3.msra.mxu1 %v1635_v38  ;;  %v1874_v38 = vld [vmem:[#allocation10 + $0x40] sm:$0xff] }
 0x413   :  { %3093 = vmatprep.subr.mxu1 %v3538_v0 }
 0x414   :  { %3094 = vmatpush3.msra.mxu1 %v1634_v39  ;;  %v2028_v39 = vld [vmem:[#allocation12 + $0x228] sm:$0xff] }
 0x415   :  { %3095 = vmatprep.subr.mxu1 %v3538_v0 }
 0x416   :  { %3096 = vmatpush3.msra.mxu1 %v1633_v41  ;;  %v1873_v41 = vld [vmem:[#allocation10 + $0x38] sm:$0xff] }
 0x417   :  { %3097 = vmatprep.subr.mxu1 %v3538_v0 }
 0x418   :  { %3098 = vmatpush3.msra.mxu1 %v1632_v45  ;;  %v2026_v45 = vld [vmem:[#allocation12 + $0x218] sm:$0xff] }
 0x419   :  { %3099 = vmatprep.subr.mxu1 %v3538_v0 }
 0x41a   :  { %3100 = vmatpush3.msra.mxu1 %v1631_v47  ;;  %v1871_v47 = vld [vmem:[#allocation10 + $0x28] sm:$0xff] }
 0x41b   :  { %3101 = vmatprep.subr.mxu1 %v3538_v0 }
 0x41c   :  { %3102 = vmatpush3.msra.mxu1 %v1630_v49  ;;  %v2024_v49 = vld [vmem:[#allocation12 + $0x208] sm:$0xff] }
 0x41d   :  { %3104 = vmatmul.mubr.f32.vlgmr.msra.gmra.mxu1 %v3939_v51  ;;  %2828 = vmatprep.subr.mxu1 %v1990_v2  ;;  %v1869_v2 = vld [vmem:[#allocation10 + $0x18] sm:$0xff] }
 0x41e   :  { %2829 = vmatpush3.msra.mxu1 %v1974_v52  ;;  %2110 = vmatprep.mubr.f32.mxu1 %v3903_v31  ;;  %v1880_v31 = vld [vmem:[#allocation10 + $0x70] sm:$0xff]  ;;  %v2023_v52 = vld [vmem:[#allocation12 + $0x200] sm:$0xff] }
 0x41f   :  { %2830 = vmatprep.subr.mxu1 %v1989_v53  ;;  %3109 = vmatpush3.msra.mxu0 %v1880_v31  ;;  %v1868_v53 = vld [vmem:[#allocation10 + $0x10] sm:$0xff]  ;;  %v2012_v31 = vld [vmem:[#allocation12 + $0x1a8] sm:$0xff] }
 0x420   :  { %2831 = vmatpush3.msra.mxu1 %v1973_v55  ;;  %3110 = vmatprep.subr.mxu0 %v3538_v0  ;;  %v1867_v55 = vld [vmem:[#allocation10 + $0x8] sm:$0xff] }
 0x421   :  { %2832 = vmatprep.subr.mxu1 %v1988_v3  ;;  %3111 = vmatpush3.msra.mxu0 %v1879_v24  ;;  %v1866_v3 = vld [vmem:[#allocation10] sm:$0xff] }
 0x422   :  { %2833 = vmatpush3.msra.mxu1 %v1972_v56  ;;  %3112 = vmatprep.subr.mxu0 %v3538_v0  ;;  %v2022_v56 = vld [vmem:[#allocation12 + $0x1f8] sm:$0xff]  ;;  %v2011_v24 = vld [vmem:[#allocation12 + $0x1a0] sm:$0xff] }
 0x423   :  { %2834 = vmatprep.subr.mxu1 %v1987_v40  ;;  %3113 = vmatpush3.msra.mxu0 %v1878_v59  ;;  %v2010_v59 = vld [vmem:[#allocation12 + $0x198] sm:$0xff] }
 0x424   :  { %2835 = vmatpush3.msra.mxu1 %v1971_v61  ;;  %3114 = vmatprep.subr.mxu0 %v3538_v0 }
 0x425   :  { %2836 = vmatprep.subr.mxu1 %v1986_v62  ;;  %3115 = vmatpush3.msra.mxu0 %v1877_v63  ;;  %v2009_v63 = vld [vmem:[#allocation12 + $0x190] sm:$0xff] }
 0x426   :  { %2837 = vmatpush3.msra.mxu1 %v1970_v22  ;;  %3116 = vmatprep.subr.mxu0 %v3538_v0  ;;  %v2626_v22 = vld [vmem:[%s4092_s10] ss:$0 sm:$0xff] }
 0x427   :  { %2838 = vmatprep.subr.mxu1 %v1985_v1  ;;  %3117 = vmatpush3.msra.mxu0 %v1876_v34  ;;  %v2008_v34 = vld [vmem:[#allocation12 + $0x188] sm:$0xff] }
 0x428   :  { %2839 = vmatpush3.msra.mxu1 %v1969_v4  ;;  %3118 = vmatprep.subr.mxu0 %v3538_v0 }
 0x429   :  { %2840 = vmatprep.subr.mxu1 %v1984_v5  ;;  %3119 = vmatpush3.msra.mxu0 %v1875_v36  ;;  %v1992_v36 = vld [vmem:[#allocation12 + $0x108] sm:$0xff] }
 0x42a   :  { %2841 = vmatpush3.msra.mxu1 %v1968_v6  ;;  %3120 = vmatprep.subr.mxu0 %v3538_v0 }
 0x42b   :  { %2842 = vmatprep.subr.mxu1 %v1983_v7  ;;  %3121 = vmatpush3.msra.mxu0 %v1874_v38 }
 0x42c   :  { %2843 = vmatpush3.msra.mxu1 %v1967_v50  ;;  %3122 = vmatprep.subr.mxu0 %v3538_v0 }
 0x42d   :  { %2844 = vmatprep.subr.mxu1 %v1982_v8  ;;  %3123 = vmatpush3.msra.mxu0 %v1873_v41 }
 0x42e   :  { %2845 = vmatpush3.msra.mxu1 %v1966_v9  ;;  %3124 = vmatprep.subr.mxu0 %v3538_v0 }
 0x42f   :  { %2846 = vmatprep.subr.mxu1 %v1981_v46  ;;  %3125 = vmatpush3.msra.mxu0 %v1872_v44  ;;  %v2006_v46 = vld [vmem:[#allocation12 + $0x178] sm:$0xff] }
 0x430   :  { %2847 = vmatpush3.msra.mxu1 %v1965_v10  ;;  %3126 = vmatprep.subr.mxu0 %v3538_v0 }
 0x431   :  { %2848 = vmatprep.subr.mxu1 %v1980_v11  ;;  %3127 = vmatpush3.msra.mxu0 %v1871_v47  ;;  %v2021_v11 = vld [vmem:[#allocation12 + $0x1f0] sm:$0xff] }
 0x432   :  { %2849 = vmatpush3.msra.mxu1 %v1964_v12  ;;  %3128 = vmatprep.subr.mxu0 %v3538_v0  ;;  %v2005_v12 = vld [vmem:[#allocation12 + $0x170] sm:$0xff] }
 0x433   :  { %2850 = vmatprep.subr.mxu1 %v1979_v13  ;;  %3129 = vmatpush3.msra.mxu0 %v1870_v48  ;;  %v2020_v13 = vld [vmem:[#allocation12 + $0x1e8] sm:$0xff] }
 0x434   :  { %2851 = vmatpush3.msra.mxu1 %v1963_v14  ;;  %3130 = vmatprep.subr.mxu0 %v3538_v0  ;;  %v2004_v14 = vld [vmem:[#allocation12 + $0x168] sm:$0xff] }
 0x435   :  { %2852 = vmatprep.subr.mxu1 %v1978_v15  ;;  %3131 = vmatpush3.msra.mxu0 %v1869_v2  ;;  %v2019_v15 = vld [vmem:[#allocation12 + $0x1e0] sm:$0xff] }
 0x436   :  { %2853 = vmatpush3.msra.mxu1 %v1962_v16  ;;  %3132 = vmatprep.subr.mxu0 %v3538_v0  ;;  %v2003_v16 = vld [vmem:[#allocation12 + $0x160] sm:$0xff] }
 0x437   :  { %2854 = vmatprep.subr.mxu1 %v1977_v23  ;;  %3133 = vmatpush3.msra.mxu0 %v1868_v53  ;;  %v2018_v23 = vld [vmem:[#allocation12 + $0x1d8] sm:$0xff] }
 0x438   :  { %2855 = vmatpush3.msra.mxu1 %v1961_v17  ;;  %3134 = vmatprep.subr.mxu0 %v3538_v0  ;;  %v2002_v17 = vld [vmem:[#allocation12 + $0x158] sm:$0xff] }
 0x439   :  { %2856 = vmatprep.subr.mxu1 %v1976_v18  ;;  %3135 = vmatpush3.msra.mxu0 %v1867_v55  ;;  %v2017_v18 = vld [vmem:[#allocation12 + $0x1d0] sm:$0xff] }
 0x43a   :  { %2857 = vmatpush3.msra.mxu1 %v1960_v19  ;;  %3136 = vmatprep.subr.mxu0 %v3538_v0  ;;  %v2001_v19 = vld [vmem:[#allocation12 + $0x150] sm:$0xff] }
 0x43b   :  { %2858 = vmatprep.subr.mxu1 %v1975_v20  ;;  %3137 = vmatpush3.msra.mxu0 %v1866_v3  ;;  %v2016_v20 = vld [vmem:[#allocation12 + $0x1c8] sm:$0xff] }
 0x43c   :  { %2859 = vmatpush3.msra.mxu1 %v1959_v21  ;;  %2863 = vmatprep.subr.mxu0 %v2022_v56  ;;  %v2000_v21 = vld [vmem:[#allocation12 + $0x148] sm:$0xff] }
 0x43d   :  { %2111 = vmatmul.mubr.f32.vlgmr.msra.gmra.mxu1 %v3907_v26  ;;  %3141 = vmatprep.subr.mxu1 %v3538_v0  ;;  %v2034_v26 = vld [vmem:[#allocation12 + $0x258] sm:$0xff] }
 0x43e   :  { %3142 = vmatpush3.msra.mxu1 %v2038_v25  ;;  %3173 = vmatprep.mubr.msk.f32.mxu1 %vm3539_vm0, %v3538_v0  ;;  %v1999_v25 = vld [vmem:[#allocation12 + $0x140] sm:$0xff] }
 0x43f   :  { %3143 = vmatprep.subr.mxu1 %v3538_v0 }
 0x440   :  { %3144 = vmatpush3.msra.mxu1 %v2037_v28  ;;  %v2014_v28 = vld [vmem:[#allocation12 + $0x1b8] sm:$0xff] }
 0x441   :  { %3145 = vmatprep.subr.mxu1 %v3538_v0 }
 0x442   :  { %3146 = vmatpush3.msra.mxu1 %v2036_v29  ;;  %v1998_v29 = vld [vmem:[#allocation12 + $0x138] sm:$0xff] }
 0x443   :  { %3147 = vmatprep.subr.mxu1 %v3538_v0 }
 0x444   :  { %3148 = vmatpush3.msra.mxu1 %v2035_v27  ;;  %v2013_v27 = vld [vmem:[#allocation12 + $0x1b0] sm:$0xff] }
 0x445   :  { %3149 = vmatprep.subr.mxu1 %v3538_v0 }
 0x446   :  { %3150 = vmatpush3.msra.mxu1 %v2034_v26  ;;  %v1996_v26 = vld [vmem:[#allocation12 + $0x128] sm:$0xff] }
 0x447   :  { %3151 = vmatprep.subr.mxu1 %v3538_v0 }
 0x448   :  { %3152 = vmatpush3.msra.mxu1 %v2033_v58  ;;  %v1995_v58 = vld [vmem:[#allocation12 + $0x120] sm:$0xff] }
 0x449   :  { %3153 = vmatprep.subr.mxu1 %v3538_v0 }
 0x44a   :  { %3154 = vmatpush3.msra.mxu1 %v2032_v60  ;;  %v1994_v60 = vld [vmem:[#allocation12 + $0x118] sm:$0xff] }
 0x44b   :  { %3155 = vmatprep.subr.mxu1 %v3538_v0 }
 0x44c   :  { %3156 = vmatpush3.msra.mxu1 %v2031_v33  ;;  %v1993_v33 = vld [vmem:[#allocation12 + $0x110] sm:$0xff] }
 0x44d   :  { %3157 = vmatprep.subr.mxu1 %v3538_v0 }
 0x44e   :  { %3158 = vmatpush3.msra.mxu1 %v2030_v35 }
 0x44f   :  { %3159 = vmatprep.subr.mxu1 %v3538_v0 }
 0x450   :  { %3160 = vmatpush3.msra.mxu1 %v2029_v37  ;;  %v2007_v37 = vld [vmem:[#allocation12 + $0x180] sm:$0xff] }
 0x451   :  { %3161 = vmatprep.subr.mxu1 %v3538_v0 }
 0x452   :  { %3162 = vmatpush3.msra.mxu1 %v2028_v39  ;;  %v1991_v39 = vld [vmem:[#allocation12 + $0x100] sm:$0xff] }
 0x453   :  { %3163 = vmatprep.subr.mxu1 %v3538_v0 }
 0x454   :  { %3164 = vmatpush3.msra.mxu1 %v2027_v42 }
 0x455   :  { %3165 = vmatprep.subr.mxu1 %v3538_v0 }
 0x456   :  { %3166 = vmatpush3.msra.mxu1 %v2026_v45 }
 0x457   :  { %3167 = vmatprep.subr.mxu1 %v3538_v0 }
 0x458   :  { %3168 = vmatpush3.msra.mxu1 %v2025_v43  ;;  %v2628_v43 = vld [vmem:[%s4096_s14] ss:$0 sm:$0xff] }
 0x459   :  { %3169 = vmatprep.subr.mxu1 %v3538_v0 }
 0x45a   :  { %3170 = vmatpush3.msra.mxu1 %v2024_v49 }
 0x45b   :  { %3171 = vmatprep.subr.mxu1 %v3538_v0 }
 0x45c   :  { %3172 = vmatpush3.msra.mxu1 %v2023_v52 }
 0x45d   :  { %3174 = vmatmul.mubr.f32.vlgmr.msra.gmra.mxu1 %v3939_v51  ;;  %3211 = vmatprep.subr.mxu1 %v3538_v0 }
 0x45e   :  { %3243 = vmatprep.mubr.msk.f32.mxu1 %vm3539_vm0, %v3538_v0 }
 0x4bd   :  { %v2756_v40 = vpop.f32.mrf.mxu1  ;;  %v2791_v62 = vpop.f32.mrf.mxu0 }
 0x4bf   :  { %v2757_v61 = vpop.f32.mrf.mxu1  ;;  %v2792_v1 = vpop.f32.mrf.mxu0 }
 0x4c0   :  { %v2758_v51 = vadd.f32 %v2757_v61, %v2756_v40  ;;  %v2793_v5 = vadd.f32 %v2792_v1, %v2791_v62  ;;  %v2303_v40 = vld [vmem:[#allocation13 + $0x78] sm:$0xff]  ;;  %v2302_v61 = vld [vmem:[#allocation13 + $0x70] sm:$0xff]  ;;  %v2301_v62 = vld [vmem:[#allocation13 + $0x68] sm:$0xff] }
 0x4c2   :  { %v1720_v4 = vadd.f32 %v2758_v51, %v2626_v22  ;;  %v2300_v51 = vld [vmem:[#allocation13 + $0x60] sm:$0xff] }
 0x4c4   :  { %v1790_v6 = vadd.f32 %v2793_v5, %v1720_v4  ;;  %v2629_v4 = vsel %vm2257_vm6, 1.0, %v3538_v0 }
 0x4dd   :  { %v1859_v7 = vpop.f32.mrf.mxu1 }
 0x4de   :  { %v1860_v50 = vadd.f32 %v1859_v7, %v1790_v6 }
 0x4df   :  { %v3105_v8 = vpop.f32.mrf.mxu1 }
 0x4e0   :  { %vm1863_vm5 = vcmp.ge.f32.partialorder %v1860_v50, 0.0  ;;  %v1864_v9 = vmul.f32 0.01, %v1860_v50  ;;  %v2298_v8 = vld [vmem:[#allocation13 + $0x50] sm:$0xff] }
 0x4e2   :  { %v1865_v10 = vsel %vm1863_vm5, %v1860_v50, %v1864_v9  ;;  %v2299_v50 = vld [vmem:[#allocation13 + $0x58] sm:$0xff]  ;;  %v2297_v9 = vld [vmem:[#allocation13 + $0x48] sm:$0xff] }
 0x4e3   :  { %3139 = vmatmul.mubr.f32.vlgmr.msra.gmra.mxu0 %v1865_v10  ;;  %v2295_v10 = vld [vmem:[#allocation13 + $0x38] sm:$0xff] }
 0x4e4   :  { %2864 = vmatpush3.msra.mxu0 %v2006_v46  ;;  %2180 = vmatprep.mubr.f32.mxu0 %v3905_v57  ;;  %v2015_v57 = vld [vmem:[#allocation12 + $0x1c0] sm:$0xff] }
 0x4e5   :  { %2865 = vmatprep.subr.mxu0 %v2021_v11  ;;  %v2296_v46 = vld [vmem:[#allocation13 + $0x40] sm:$0xff]  ;;  %v2294_v11 = vld [vmem:[#allocation13 + $0x30] sm:$0xff] }
 0x4e6   :  { %2866 = vmatpush3.msra.mxu0 %v2005_v12  ;;  %v2293_v12 = vld [vmem:[#allocation13 + $0x28] sm:$0xff] }
 0x4e7   :  { %2867 = vmatprep.subr.mxu0 %v2020_v13  ;;  %v2292_v13 = vld [vmem:[#allocation13 + $0x20] sm:$0xff] }
 0x4e8   :  { %2868 = vmatpush3.msra.mxu0 %v2004_v14  ;;  %v2291_v14 = vld [vmem:[#allocation13 + $0x18] sm:$0xff] }
 0x4e9   :  { %2869 = vmatprep.subr.mxu0 %v2019_v15  ;;  %v2290_v15 = vld [vmem:[#allocation13 + $0x10] sm:$0xff] }
 0x4ea   :  { %2870 = vmatpush3.msra.mxu0 %v2003_v16  ;;  %v2289_v16 = vld [vmem:[#allocation13 + $0x8] sm:$0xff] }
 0x4eb   :  { %2871 = vmatprep.subr.mxu0 %v2018_v23  ;;  %v2288_v23 = vld [vmem:[#allocation13] sm:$0xff] }
 0x4ec   :  { %2872 = vmatpush3.msra.mxu0 %v2002_v17  ;;  %v2399_v17 = vld [vmem:[#allocation15 + $0x78] sm:$0xff] }
 0x4ed   :  { %2873 = vmatprep.subr.mxu0 %v2017_v18  ;;  %v2398_v18 = vld [vmem:[#allocation15 + $0x70] sm:$0xff]  ;;  %3212 = vmatpush3.msra.mxu1 %v2399_v17 }
 0x4ee   :  { %2874 = vmatpush3.msra.mxu0 %v2001_v19  ;;  %3213 = vmatprep.subr.mxu1 %v3538_v0  ;;  %v2397_v19 = vld [vmem:[#allocation15 + $0x68] sm:$0xff] }
 0x4ef   :  { %2875 = vmatprep.subr.mxu0 %v2016_v20  ;;  %3214 = vmatpush3.msra.mxu1 %v2398_v18  ;;  %v2396_v20 = vld [vmem:[#allocation15 + $0x60] sm:$0xff] }
 0x4f0   :  { %2876 = vmatpush3.msra.mxu0 %v2000_v21  ;;  %3215 = vmatprep.subr.mxu1 %v3538_v0  ;;  %v2395_v21 = vld [vmem:[#allocation15 + $0x58] sm:$0xff] }
 0x4f1   :  { %2877 = vmatprep.subr.mxu0 %v2015_v57  ;;  %3216 = vmatpush3.msra.mxu1 %v2397_v19  ;;  %v2394_v57 = vld [vmem:[#allocation15 + $0x50] sm:$0xff] }
 0x4f2   :  { %2878 = vmatpush3.msra.mxu0 %v1999_v25  ;;  %3217 = vmatprep.subr.mxu1 %v3538_v0  ;;  %v2393_v25 = vld [vmem:[#allocation15 + $0x48] sm:$0xff] }
 0x4f3   :  { %2879 = vmatprep.subr.mxu0 %v2014_v28  ;;  %3218 = vmatpush3.msra.mxu1 %v2396_v20  ;;  %v2392_v28 = vld [vmem:[#allocation15 + $0x40] sm:$0xff] }
 0x4f4   :  { %2880 = vmatpush3.msra.mxu0 %v1998_v29  ;;  %3219 = vmatprep.subr.mxu1 %v3538_v0  ;;  %v2391_v29 = vld [vmem:[#allocation15 + $0x38] sm:$0xff] }
 0x4f5   :  { %2881 = vmatprep.subr.mxu0 %v2013_v27  ;;  %3220 = vmatpush3.msra.mxu1 %v2395_v21  ;;  %v2390_v27 = vld [vmem:[#allocation15 + $0x30] sm:$0xff]  ;;  %v2636_v21 = vld [vmem:[%s4105_s23] ss:$0 sm:$0xff] }
 0x4f6   :  { %2882 = vmatpush3.msra.mxu0 %v1997_v30  ;;  %3221 = vmatprep.subr.mxu1 %v3538_v0  ;;  %v2389_v30 = vld [vmem:[#allocation15 + $0x28] sm:$0xff] }
 0x4f7   :  { %2883 = vmatprep.subr.mxu0 %v2012_v31  ;;  %3222 = vmatpush3.msra.mxu1 %v2394_v57  ;;  %v2388_v31 = vld [vmem:[#allocation15 + $0x20] sm:$0xff] }
 0x4f8   :  { %2884 = vmatpush3.msra.mxu0 %v1996_v26  ;;  %3223 = vmatprep.subr.mxu1 %v3538_v0  ;;  %v2387_v26 = vld [vmem:[#allocation15 + $0x18] sm:$0xff] }
 0x4f9   :  { %2885 = vmatprep.subr.mxu0 %v2011_v24  ;;  %3224 = vmatpush3.msra.mxu1 %v2393_v25  ;;  %v2637_v25 = vld [vmem:[%s4106_s24] ss:$0 sm:$0xff] }
 0x4fa   :  { %2886 = vmatpush3.msra.mxu0 %v1995_v58  ;;  %3225 = vmatprep.subr.mxu1 %v3538_v0 }
 0x4fb   :  { %2887 = vmatprep.subr.mxu0 %v2010_v59  ;;  %3226 = vmatpush3.msra.mxu1 %v2392_v28 }
 0x4fc   :  { %2888 = vmatpush3.msra.mxu0 %v1994_v60  ;;  %3227 = vmatprep.subr.mxu1 %v3538_v0 }
 0x4fd   :  { %2889 = vmatprep.subr.mxu0 %v2009_v63  ;;  %v2860_v35 = vpop.f32.mrf.mxu1  ;;  %3228 = vmatpush3.msra.mxu1 %v2391_v29  ;;  %v2630_v63 = vld [vmem:[%s4097_s15] ss:$0 sm:$0xff] }
 0x4fe   :  { %2890 = vmatpush3.msra.mxu0 %v1993_v33  ;;  %3229 = vmatprep.subr.mxu1 %v3538_v0 }
 0x4ff   :  { %2891 = vmatprep.subr.mxu0 %v2008_v34  ;;  %v2861_v38 = vpop.f32.mrf.mxu1  ;;  %3230 = vmatpush3.msra.mxu1 %v2390_v27  ;;  %v2631_v34 = vld [vmem:[%s4098_s16] ss:$0 sm:$0xff] }
 0x500   :  { %v2862_v41 = vadd.f32 %v2861_v38, %v2860_v35  ;;  %2892 = vmatpush3.msra.mxu0 %v1992_v36  ;;  %3231 = vmatprep.subr.mxu1 %v3538_v0  ;;  %v2491_v38 = vld [vmem:[#allocation16 + $0x70] sm:$0xff] }
 0x501   :  { %2893 = vmatprep.subr.mxu0 %v2007_v37  ;;  %3232 = vmatpush3.msra.mxu1 %v2389_v30  ;;  %v2492_v37 = vld [vmem:[#allocation16 + $0x78] sm:$0xff] }
 0x502   :  { %2894 = vmatpush3.msra.mxu0 %v1991_v39  ;;  %v2113_v2 = vadd.f32 %v2862_v41, %v2628_v43  ;;  %3233 = vmatprep.subr.mxu1 %v3538_v0  ;;  %v2490_v39 = vld [vmem:[#allocation16 + $0x68] sm:$0xff]  ;;  %v2489_v41 = vld [vmem:[#allocation16 + $0x60] sm:$0xff]  ;;  %v2484_v43 = vld [vmem:[#allocation16 + $0x38] sm:$0xff] }
 0x503   :  { %2181 = vmatmul.mubr.f32.vlgmr.msra.gmra.mxu0 %v3909_v32  ;;  %3176 = vmatprep.subr.mxu0 %v3538_v0  ;;  %v2627_v32 = vld [vmem:[%s4094_s12] ss:$0 sm:$0xff] }
 0x504   :  { %3208 = vmatprep.mubr.msk.f32.mxu0 %vm3539_vm0, %v3538_v0  ;;  %3177 = vmatpush3.msra.mxu0 %v2303_v40  ;;  %v2384_v40 = vld [vmem:[#allocation15] sm:$0xff] }
 0x505   :  { %3178 = vmatprep.subr.mxu0 %v3538_v0  ;;  %3234 = vmatpush3.msra.mxu1 %v2388_v31 }
 0x506   :  { %3179 = vmatpush3.msra.mxu0 %v2302_v61  ;;  %3235 = vmatprep.subr.mxu1 %v3538_v0  ;;  %v2632_v61 = vld [vmem:[%s4100_s18] ss:$0 sm:$0xff] }
 0x507   :  { %3180 = vmatprep.subr.mxu0 %v3538_v0  ;;  %3236 = vmatpush3.msra.mxu1 %v2387_v26 }
 0x508   :  { %3181 = vmatpush3.msra.mxu0 %v2301_v62  ;;  %3237 = vmatprep.subr.mxu1 %v3538_v0 }
 0x509   :  { %3182 = vmatprep.subr.mxu0 %v3538_v0 }
 0x50a   :  { %3183 = vmatpush3.msra.mxu0 %v2300_v51 }
 0x50b   :  { %3184 = vmatprep.subr.mxu0 %v3538_v0 }
 0x50c   :  { %3185 = vmatpush3.msra.mxu0 %v2299_v50  ;;  %v2633_v50 = vld [vmem:[%s4102_s20] ss:$0 sm:$0xff] }
 0x50d   :  { %3186 = vmatprep.subr.mxu0 %v3538_v0 }
 0x50e   :  { %3187 = vmatpush3.msra.mxu0 %v2298_v8 }
 0x50f   :  { %3188 = vmatprep.subr.mxu0 %v3538_v0 }
 0x510   :  { %3189 = vmatpush3.msra.mxu0 %v2297_v9 }
 0x511   :  { %3190 = vmatprep.subr.mxu0 %v3538_v0 }
 0x512   :  { %3191 = vmatpush3.msra.mxu0 %v2296_v46 }
 0x513   :  { %3192 = vmatprep.subr.mxu0 %v3538_v0 }
 0x514   :  { %3193 = vmatpush3.msra.mxu0 %v2295_v10 }
 0x515   :  { %3194 = vmatprep.subr.mxu0 %v3538_v0 }
 0x516   :  { %3195 = vmatpush3.msra.mxu0 %v2294_v11 }
 0x517   :  { %3196 = vmatprep.subr.mxu0 %v3538_v0 }
 0x518   :  { %3197 = vmatpush3.msra.mxu0 %v2293_v12 }
 0x519   :  { %3198 = vmatprep.subr.mxu0 %v3538_v0 }
 0x51a   :  { %3199 = vmatpush3.msra.mxu0 %v2292_v13 }
 0x51b   :  { %3200 = vmatprep.subr.mxu0 %v3538_v0 }
 0x51c   :  { %3201 = vmatpush3.msra.mxu0 %v2291_v14  ;;  %v2635_v14 = vsel %vm2571_vm8, 1.0, %v3538_v0 }
 0x51d   :  { %v2252_v42 = vpop.f32.mrf.mxu1  ;;  %3202 = vmatprep.subr.mxu0 %v3538_v0 }
 0x51e   :  { %3203 = vmatpush3.msra.mxu0 %v2290_v15 }
 0x51f   :  { %v3175_v44 = vpop.f32.mrf.mxu1  ;;  %3204 = vmatprep.subr.mxu0 %v3538_v0 }
 0x520   :  { %3205 = vmatpush3.msra.mxu0 %v2289_v16  ;;  %v2487_v44 = vld [vmem:[#allocation16 + $0x50] sm:$0xff] }
 0x521   :  { %3206 = vmatprep.subr.mxu0 %v3538_v0 }
 0x522   :  { %3207 = vmatpush3.msra.mxu0 %v2288_v23 }
 0x523   :  { %3246 = vmatprep.subr.mxu0 %v3538_v0 }
 0x5a3   :  { %v1955_v45 = vpop.f32.mrf.mxu0 }
 0x5a4   :  { %v1956_v55 = vadd.f32 %v2627_v32, %v1955_v45  ;;  %v2486_v45 = vld [vmem:[#allocation16 + $0x48] sm:$0xff]  ;;  %v2479_v32 = vld [vmem:[#allocation16 + $0x10] sm:$0xff] }
 0x5a5   :  { %v3140_v47 = vpop.f32.mrf.mxu0 }
 0x5a6   :  { %v2485_v47 = vld [vmem:[#allocation16 + $0x40] sm:$0xff] }
 0x5c3   :  { %v2895_v48 = vpop.f32.mrf.mxu0 }
 0x5c5   :  { %v2896_v49 = vpop.f32.mrf.mxu0 }
 0x5c6   :  { %v2897_v52 = vadd.f32 %v2896_v49, %v2895_v48  ;;  %v2483_v48 = vld [vmem:[#allocation16 + $0x30] sm:$0xff]  ;;  %v2482_v49 = vld [vmem:[#allocation16 + $0x28] sm:$0xff] }
 0x5c8   :  { %v2183_v53 = vadd.f32 %v2897_v52, %v2113_v2  ;;  %v2481_v2 = vld [vmem:[#allocation16 + $0x20] sm:$0xff]  ;;  %v2480_v52 = vld [vmem:[#allocation16 + $0x18] sm:$0xff] }
 0x5ca   :  { %v2253_v3 = vadd.f32 %v2252_v42, %v2183_v53  ;;  %v2488_v42 = vld [vmem:[#allocation16 + $0x58] sm:$0xff]  ;;  %v2478_v53 = vld [vmem:[#allocation16 + $0x8] sm:$0xff] }
 0x5cc   :  { %v2256_v56 = vadd.f32 %v2253_v3, %v1956_v55  ;;  %v2477_v55 = vld [vmem:[#allocation16] sm:$0xff]  ;;  %v2386_v3 = vld [vmem:[#allocation15 + $0x10] sm:$0xff] }
 0x5cd   :  { %3238 = vmatpush3.msra.mxu1 %v2386_v3 }
 0x5ce   :  { %2260 = vadd.xlane.f32.xlu1 %v2256_v56  ;;  %3239 = vmatprep.subr.mxu1 %v3538_v0 }
 0x657   :  { %v2261_v22 = vpop.xlane.xlu1 %2260 }
 0x658   :  { %v2262_v1 = vmul.f32 0.03125, %v2261_v22 }
 0x65a   :  { %v2263_v5 = vsub.f32 %v2256_v56, %v2262_v1  ;;  %v2385_v56 = vld [vmem:[#allocation15 + $0x8] sm:$0xff] }
 0x65b   :  { %3240 = vmatpush3.msra.mxu1 %v2385_v56 }
 0x65c   :  { %v4001_v6 = vmul.f32 %v2629_v4, %v2263_v5  ;;  %3241 = vmatprep.subr.mxu1 %v3538_v0 }
 0x65d   :  { %3242 = vmatpush3.msra.mxu1 %v2384_v40 }
 0x65e   :  { %v2265_v7 = vmul.f32 %v4001_v6, %v4001_v6 }
 0x660   :  { %2266 = vadd.xlane.f32.xlu1 %v2265_v7  ;;  %v2634_v7 = vld [vmem:[%s4104_s22] ss:$0 sm:$0xff] }
 0x6e9   :  { %v2267_v24 = vpop.xlane.xlu1 %2266 }
 0x6ea   :  { %v2268_v58 = vmul.f32 0.03125, %v2267_v24 }
 0x6ec   :  { %v2269_v59 = vadd.f32 1e-05, %v2268_v58 }
 0x6ee   :  { %3301 = vrsqrt.f32 %v2269_v59 }
 0x6fb   :  { %v3302_v60 = vpop.eup %3301 }
 0x6fc   :  { %v2271_v33 = vmul.f32 %v3302_v60, %v4001_v6 }
 0x6fe   :  { %v2279_v35 = vmul.f32 %v2630_v63, %v2271_v33 }
 0x700   :  { %v2287_v36 = vadd.f32 %v2631_v34, %v2279_v35 }
 0x702   :  { %3209 = vmatmul.mubr.f32.vlgmr.msra.gmra.mxu0 %v2287_v36 }
 0x703   :  { %3247 = vmatpush3.msra.mxu0 %v2492_v37  ;;  %3278 = vmatprep.mubr.msk.f32.mxu0 %vm3539_vm0, %v3538_v0 }
 0x704   :  { %3248 = vmatprep.subr.mxu0 %v3538_v0 }
 0x705   :  { %3249 = vmatpush3.msra.mxu0 %v2491_v38 }
 0x706   :  { %3250 = vmatprep.subr.mxu0 %v3538_v0 }
 0x707   :  { %3251 = vmatpush3.msra.mxu0 %v2490_v39 }
 0x708   :  { %3252 = vmatprep.subr.mxu0 %v3538_v0 }
 0x709   :  { %3253 = vmatpush3.msra.mxu0 %v2489_v41 }
 0x70a   :  { %3254 = vmatprep.subr.mxu0 %v3538_v0 }
 0x70b   :  { %3255 = vmatpush3.msra.mxu0 %v2488_v42 }
 0x70c   :  { %3256 = vmatprep.subr.mxu0 %v3538_v0 }
 0x70d   :  { %3257 = vmatpush3.msra.mxu0 %v2487_v44 }
 0x70e   :  { %3258 = vmatprep.subr.mxu0 %v3538_v0 }
 0x70f   :  { %3259 = vmatpush3.msra.mxu0 %v2486_v45 }
 0x710   :  { %3260 = vmatprep.subr.mxu0 %v3538_v0 }
 0x711   :  { %3261 = vmatpush3.msra.mxu0 %v2485_v47 }
 0x712   :  { %3262 = vmatprep.subr.mxu0 %v3538_v0 }
 0x713   :  { %3263 = vmatpush3.msra.mxu0 %v2484_v43 }
 0x714   :  { %3264 = vmatprep.subr.mxu0 %v3538_v0 }
 0x715   :  { %3265 = vmatpush3.msra.mxu0 %v2483_v48 }
 0x716   :  { %3266 = vmatprep.subr.mxu0 %v3538_v0 }
 0x717   :  { %3267 = vmatpush3.msra.mxu0 %v2482_v49 }
 0x718   :  { %3268 = vmatprep.subr.mxu0 %v3538_v0 }
 0x719   :  { %3269 = vmatpush3.msra.mxu0 %v2481_v2 }
 0x71a   :  { %3270 = vmatprep.subr.mxu0 %v3538_v0 }
 0x71b   :  { %3271 = vmatpush3.msra.mxu0 %v2480_v52 }
 0x71c   :  { %3272 = vmatprep.subr.mxu0 %v3538_v0 }
 0x71d   :  { %3273 = vmatpush3.msra.mxu0 %v2479_v32 }
 0x71e   :  { %3274 = vmatprep.subr.mxu0 %v3538_v0 }
 0x71f   :  { %3275 = vmatpush3.msra.mxu0 %v2478_v53 }
 0x720   :  { %3276 = vmatprep.subr.mxu0 %v3538_v0 }
 0x721   :  { %3277 = vmatpush3.msra.mxu0 %v2477_v55 }
 0x722   :  { %3279 = vmatmul.mubr.f32.vlgmr.msra.gmra.mxu0 %v2287_v36 }
 0x7c2   :  { %v2377_v62 = vpop.f32.mrf.mxu0 }
 0x7c3   :  { %v2378_v51 = vadd.f32 %v2632_v61, %v2377_v62 }
 0x7c4   :  { %v3210_v22 = vpop.f32.mrf.mxu0 }
 0x7c5   :  { %vm2381_vm7 = vcmp.ge.f32.partialorder %v2378_v51, 0.0  ;;  %v2382_v1 = vmul.f32 0.01, %v2378_v51 }
 0x7c7   :  { %v2383_v4 = vsel %vm2381_vm7, %v2378_v51, %v2382_v1 }
 0x7c8   :  { %3244 = vmatmul.mubr.f32.vlgmr.msra.gmra.mxu1 %v2383_v4 }
 0x7e2   :  { %v2566_v5 = vpop.f32.mrf.mxu0 }
 0x7e3   :  { %v2567_v9 = vadd.f32 %v2634_v7, %v2566_v5 }
 0x7e4   :  { %v3280_v6 = vpop.f32.mrf.mxu0 }
 0x888   :  { %v2473_v8 = vpop.f32.mrf.mxu1 }
 0x889   :  { %v2474_v46 = vadd.f32 %v2633_v50, %v2473_v8 }
 0x88a   :  { %v3245_v10 = vpop.f32.mrf.mxu1 }
 0x88b   :  { %v2570_v11 = vadd.f32 %v2567_v9, %v2474_v46 }
 0x88d   :  { %2574 = vadd.xlane.f32.xlu0 %v2570_v11 }
 0x916   :  { %v2575_v12 = vpop.xlane.xlu0 %2574 }
 0x917   :  { %v2576_v13 = vmul.f32 0.5, %v2575_v12 }
 0x919   :  { %v2577_v15 = vsub.f32 %v2570_v11, %v2576_v13 }
 0x91b   :  { %v2578_v16 = vmul.f32 %v2635_v14, %v2577_v15 }
 0x91d   :  { %v2579_v23 = vmul.f32 %v2578_v16, %v2578_v16 }
 0x91f   :  { %2580 = vadd.xlane.f32.xlu1 %v2579_v23 }
 0x9a8   :  { %v2581_v17 = vpop.xlane.xlu1 %2580 }
 0x9a9   :  { %v2582_v18 = vmul.f32 0.5, %v2581_v17 }
 0x9ab   :  { %v2583_v19 = vadd.f32 1e-05, %v2582_v18 }
 0x9ad   :  { %3303 = vrsqrt.f32 %v2583_v19 }
 0x9ba   :  { %v3304_v20 = vpop.eup %3303 }
 0x9bb   :  { %v2585_v57 = vmul.f32 %v3304_v20, %v2578_v16 }
 0x9bd   :  { %v2593_v28 = vmul.f32 %v2636_v21, %v2585_v57 }
 0x9bf   :  { %v2601_v0 = vadd.f32 %v2637_v25, %v2593_v28 }
 0x9c1   :  { %v2603_v29 = vsel %vm2571_vm8, %v2601_v0, -1e+30 }
 0x9c2   :  { %2604 = vmax.xlane.f32.xlu0 %v2603_v29 }
 0xa4b   :  { %v2605_v27 = vpop.xlane.xlu0 %2604 }
 0xa4c   :  { %v2606_v30 = vsub.f32 %v2603_v29, %v2605_v27 }
 0xa4e   :  { %v2607_v31 = vmul.f32 1.442695, %v2606_v30 }
 0xa50   :  { %3305 = vpow2.f32 %v2607_v31 }
 0xa5d   :  { %v3306_v26 = vpop.eup %3305 }
 0xa5e   :  { %v2609_v24 = vsel %vm2571_vm8, %v3306_v26, 0.0 }
 0xa5f   :  { %2610 = vadd.xlane.f32.xlu1 %v2609_v24 }
 0xae8   :  { %v2611_v58 = vpop.xlane.xlu1 %2610 }
 0xae9   :  { %3307 = vrcp.f32 %v2611_v58 }
 0xaf6   :  { %v3308_v59 = vpop.eup %3307 }
 0xaf7   :  { %v2613_v60 = vmul.f32 %v3308_v59, %v2609_v24 }
 0xaf9   :  { %2614 = vst [vmem:[%s4107_s25] sm:$0xff] %v2613_v60 }
 0xafa   :  { %2619 = vsyncpa [#allocation3], 1 }
 0xafb   :  { %2620 = vsyncpa [#allocation5], 1 }
 0xafc   :  { %2621 = vsyncpa [#allocation8], 1 }
 0xafd   :  { %2622 = vsyncpa [#allocation11], 1 }
 0xafe   :  { %2623 = vsyncpa [#allocation14], 1 }
 0xaff   :  { %2624 = vsyncpa [#allocation17], 1 }

</bundles_post_ra>
